<compile_context>
chip_gen: v7x
topology: tpu7x:2x2x1
jax: 0.10.0
libtpu: 0.0.40
codegen_flags: <defaults>
</compile_context>

<pallas_src>
import jax
import jax.numpy as jnp
from jax.experimental import pallas as pl
from jax.experimental.pallas import tpu as pltpu

INTERM_DIM = 128


def _round_up(x, m):
    return ((x + m - 1) // m) * m


def _make_lossnet_kernel(num_layers, exp_rows, row_offsets):
    """Kernel for a fixed number of feature levels (all layout info static)."""

    def kernel(*refs):
        # refs: x_0..x_{L-1}  (bn, C_i*HW_i)            native dtype, lane-dense
        #       w_pack        (sum_pad8(C_i*HW_i), 128)  GAP + 1/HW folded in
        #       b_cat         (1, L*128)                 f32
        #       wf_row        (1, L*128)                 f32 (final linear weight)
        #       b_fin         (1,)                       f32 in SMEM
        #       out           (bn, 1)                    f32
        x_refs = refs[:num_layers]
        w_pack_ref, b_cat_ref, wf_ref, b_fin_ref, out_ref = refs[num_layers:]

        acc = jnp.zeros(out_ref.shape, dtype=jnp.float32)
        for i in range(num_layers):
            rows, off = exp_rows[i], row_offsets[i]
            # GAP + FC in one MXU matmul: the weights carry the 1/HW pool scale,
            # so no f32 feature copy and no explicit lane-sum reduce is needed.
            h = jnp.dot(x_refs[i][...], w_pack_ref[off:off + rows, :],
                        preferred_element_type=jnp.float32)
            h = h + b_cat_ref[:, i * INTERM_DIM:(i + 1) * INTERM_DIM]
            h = jnp.maximum(h, 0.0)                              # ReLU
            # Final Linear contribution: VPU multiply + lane-sum (no 1-col MXU op).
            wf = wf_ref[:, i * INTERM_DIM:(i + 1) * INTERM_DIM]
            acc = acc + jnp.sum(h * wf, axis=-1, keepdims=True)
        out_ref[...] = acc + b_fin_ref[0]

    return kernel


def _pick_batch_block(n, per_row_bytes, fixed_bytes,
                      max_block=1024, vmem_budget=28 * 1024 * 1024):
    """Largest batch block whose *pipeline* footprint fits the VMEM budget.

    per_row_bytes already includes double-buffering of the feature inputs and
    the in-kernel f32 temporaries; fixed_bytes covers the replicated parameter
    operands.  The 28 MiB budget is safe for v7x (64 MiB / TC) and comfortably
    under the physical VMEM of v5e / v6e.
    """
    avail = max(vmem_budget - fixed_bytes, 1 << 20)
    cap = max(8, min(max_block, avail // max(per_row_bytes, 1)))
    cap -= cap % 8
    cap = max(cap, 8)
    if n <= 8:
        return n                       # single tiny block (full-dim block is legal)
    if n <= cap:
        # Split into >= 2 grid steps so the "parallel" axis feeds both v7x cores.
        return min(cap, _round_up((n + 1) // 2, 8))
    return cap


def lossnet_forward(features, fc_ws, fc_bs, w_final, b_final):
    """features: list of NCHW arrays (f32 or bf16). Returns (N, 1) float32."""
    num_layers = len(features)
    n = features[0].shape[0]
    channels = tuple(int(f.shape[1]) for f in features)
    hws = tuple(int(f.shape[2]) * int(f.shape[3]) for f in features)
    exp_rows = tuple(c * hw for c, hw in zip(channels, hws))

    feat_dtype = features[0].dtype
    # bf16 features multiply against bf16 expanded weights directly on the MXU;
    # everything else runs the matmul in f32 (no feature-tile promotion either way).
    w_dtype = jnp.bfloat16 if feat_dtype == jnp.bfloat16 else jnp.float32
    # TODO(synk): feature dtypes other than f32/bf16 would promote the feature tile
    # inside the kernel; cast them to bf16/f32 upstream before calling this wrapper.

    # Feature glue: reshape only (contiguous NCHW -> (N, C*H*W); free, lane-dense).
    xs = [f.reshape(f.shape[0], -1) for f in features]

    # --- pack parameters (tiny arrays) -------------------------------------------
    # Row-expand each (C,128) FC weight to (C*HW,128) with the 1/HW average-pool
    # scale folded in, so GAP + FC become a single lane-dense matmul per level.
    w_blocks, row_offsets, off = [], [], 0
    for i, (c, hw) in enumerate(zip(channels, hws)):
        rows = c * hw
        w_exp = jnp.repeat(fc_ws[i].astype(jnp.float32), hw, axis=0) / float(hw)
        pad = _round_up(rows, 8) - rows
        if pad:
            w_exp = jnp.concatenate(
                [w_exp, jnp.zeros((pad, INTERM_DIM), jnp.float32)], axis=0)
        w_blocks.append(w_exp.astype(w_dtype))
        row_offsets.append(off)
        off += rows + pad
    total_rows = off
    w_pack = jnp.concatenate(w_blocks, axis=0)

    b_cat = jnp.concatenate(
        [b.reshape(1, INTERM_DIM).astype(jnp.float32) for b in fc_bs], axis=1)
    wf_row = w_final.astype(jnp.float32).reshape(1, num_layers * INTERM_DIM)
    b_fin = b_final.astype(jnp.float32).reshape(1)

    # --- batch grid, sized for the real pipeline footprint ------------------------
    per_sample_bytes = sum(r * xs[i].dtype.itemsize for i, r in enumerate(exp_rows))
    temp_per_row = num_layers * INTERM_DIM * 4 + 64          # f32 h tiles + acc
    per_row_bytes = 2 * per_sample_bytes + temp_per_row      # 2x: double buffering
    param_bytes = (total_rows * INTERM_DIM * jnp.dtype(w_dtype).itemsize
                   + 2 * num_layers * INTERM_DIM * 4 + 16)
    fixed_bytes = 2 * param_bytes                            # params double-buffered too
    bn = _pick_batch_block(n, per_row_bytes, fixed_bytes)
    grid = (pl.cdiv(n, bn),)

    vmem_need = bn * per_row_bytes + fixed_bytes + 2 * bn * 4
    vmem_limit = int(min(max(2 * vmem_need, 24 << 20), 48 << 20))

    in_specs = [pl.BlockSpec((bn, exp_rows[i]), lambda b: (b, 0))
                for i in range(num_layers)]
    in_specs += [
        pl.BlockSpec((total_rows, INTERM_DIM), lambda b: (0, 0)),
        pl.BlockSpec((1, num_layers * INTERM_DIM), lambda b: (0, 0)),
        pl.BlockSpec((1, num_layers * INTERM_DIM), lambda b: (0, 0)),
        pl.BlockSpec(memory_space=pltpu.MemorySpace.SMEM),
    ]
    out_specs = pl.BlockSpec((bn, 1), lambda b: (b, 0))

    # --- cost estimate (advisory) --------------------------------------------------
    flops = 0
    for r in exp_rows:
        flops += 2 * n * r * INTERM_DIM          # GAP-folded FC matmul
        flops += 5 * n * INTERM_DIM              # bias + relu + final mul/reduce
    bytes_accessed = per_sample_bytes * n + param_bytes + 4 * n
    cost = pl.CostEstimate(flops=int(flops), transcendentals=0,
                           bytes_accessed=int(bytes_accessed))

    return pl.pallas_call(
        _make_lossnet_kernel(num_layers, exp_rows, tuple(row_offsets)),
        out_shape=jax.ShapeDtypeStruct((n, 1), jnp.float32),
        grid=grid,
        in_specs=in_specs,
        out_specs=out_specs,
        compiler_params=pltpu.CompilerParams(
            dimension_semantics=("parallel",),
            vmem_limit_bytes=vmem_limit),
        cost_estimate=cost,
    )(*xs, w_pack, b_cat, wf_row, b_fin)


def lossnet_reference(features, fc_ws, fc_bs, w_final, b_final):
    """Pure-JAX reference mirroring the PyTorch forward."""
    outs = []
    for i, f in enumerate(features):
        gap = jnp.mean(f.astype(jnp.float32), axis=(2, 3))         # AvgPool2d(H) + flatten
        h = jax.nn.relu(gap @ fc_ws[i].astype(jnp.float32) + fc_bs[i].astype(jnp.float32))
        outs.append(h)
    cat = jnp.concatenate(outs, axis=1)
    return cat @ w_final.astype(jnp.float32) + b_final.astype(jnp.float32).reshape(1, 1)


if __name__ == "__main__":
    key = jax.random.PRNGKey(0)

    # Small ResNet-like intermediate feature shapes (NCHW), batch = 2.
    feature_shapes = [(2, 8, 16, 16), (2, 16, 8, 8), (2, 32, 4, 4)]
    num_layers = len(feature_shapes)

    keys = jax.random.split(key, 2 * num_layers + 3)
    features = [jax.random.normal(keys[i], s, dtype=jnp.float32)
                for i, s in enumerate(feature_shapes)]

    # Deterministic init, mimicking nn.Linear's U(-1/sqrt(fan_in), 1/sqrt(fan_in)).
    fc_ws, fc_bs = [], []
    for i, s in enumerate(feature_shapes):
        c = s[1]
        bound = 1.0 / (c ** 0.5)
        kw, kb = jax.random.split(keys[num_layers + i])
        fc_ws.append(jax.random.uniform(kw, (c, INTERM_DIM), jnp.float32, -bound, bound))
        fc_bs.append(jax.random.uniform(kb, (INTERM_DIM,), jnp.float32, -bound, bound))

    fin = num_layers * INTERM_DIM
    bound = 1.0 / (fin ** 0.5)
    w_final = jax.random.uniform(keys[-2], (fin, 1), jnp.float32, -bound, bound)
    b_final = jax.random.uniform(keys[-1], (1,), jnp.float32, -bound, bound)

    out = lossnet_forward(features, fc_ws, fc_bs, w_final, b_final)
    out = jax.block_until_ready(out)

    ref = lossnet_reference(features, fc_ws, fc_bs, w_final, b_final)
    assert out.shape == (2, 1), out.shape
    assert jnp.allclose(out, ref, atol=1e-4, rtol=1e-4), (out, ref)

    print("KERNEL_OK")
</pallas_src>

<mosaic_0001>
module attributes {stable_mosaic.version = 11 : i64} {
  func.func @kernel(%arg0: i32, %arg1: memref<2x2048xf32, #tpu.memory_space<vmem>>, %arg2: memref<2x1024xf32, #tpu.memory_space<vmem>>, %arg3: memref<2x512xf32, #tpu.memory_space<vmem>>, %arg4: memref<3584x128xf32, #tpu.memory_space<vmem>>, %arg5: memref<1x384xf32, #tpu.memory_space<vmem>>, %arg6: memref<1x384xf32, #tpu.memory_space<vmem>>, %arg7: memref<1xf32, #tpu.memory_space<smem>>, %arg8: memref<2x1xf32, #tpu.memory_space<vmem>>) attributes {dimension_semantics = [#tpu.dimension_semantics<parallel>], iteration_bounds = array<i64: 1>, scalar_prefetch = 0 : i64, scratch_operands = 0 : i64, tpu.core_type = #tpu.core_type<tc>, window_params = [{transform_indices = @transform_0, window_bounds = array<i64: 2, 2048>}, {transform_indices = @transform_1, window_bounds = array<i64: 2, 1024>}, {transform_indices = @transform_2, window_bounds = array<i64: 2, 512>}, {pipeline_mode = #tpu.pipeline_mode<synchronous>, transform_indices = @transform_3, window_bounds = array<i64: 3584, 128>}, {pipeline_mode = #tpu.pipeline_mode<synchronous>, transform_indices = @transform_4, window_bounds = array<i64: 1, 384>}, {pipeline_mode = #tpu.pipeline_mode<synchronous>, transform_indices = @transform_5, window_bounds = array<i64: 1, 384>}, {transform_indices = @transform_6, window_bounds = array<i64: 1>}, {transform_indices = @transform_7, window_bounds = array<i64: 2, 1>}]} {
    %cst = arith.constant 0.000000e+00 : f32
    %0 = vector.broadcast %cst : f32 to vector<2x1xf32>
    %c0 = arith.constant 0 : index
    %c0_0 = arith.constant 0 : index
    %1 = vector.load %arg1[%c0, %c0_0] : memref<2x2048xf32, #tpu.memory_space<vmem>>, vector<2x2048xf32>
    %c0_1 = arith.constant 0 : index
    %c0_2 = arith.constant 0 : index
    %2 = vector.load %arg4[%c0_1, %c0_2] : memref<3584x128xf32, #tpu.memory_space<vmem>>, vector<2048x128xf32>
    %cst_3 = arith.constant dense<0.000000e+00> : vector<2x128xf32>
    %3 = tpu.matmul %1, %2, %cst_3 {dimension_numbers = #tpu.dot_dimension_numbers<[1], [0], [0], [1], [0, 0, 1, 1], [], []>} : vector<2x2048xf32>, vector<2048x128xf32>, vector<2x128xf32> -> vector<2x128xf32>
    %c0_4 = arith.constant 0 : index
    %c0_5 = arith.constant 0 : index
    %4 = vector.load %arg5[%c0_4, %c0_5] : memref<1x384xf32, #tpu.memory_space<vmem>>, vector<1x128xf32>
    %5 = vector.broadcast %4 : vector<1x128xf32> to vector<2x128xf32>
    %6 = arith.addf %3, %5 : vector<2x128xf32>
    %cst_6 = arith.constant 0.000000e+00 : f32
    %7 = vector.broadcast %cst_6 : f32 to vector<2x128xf32>
    %8 = arith.maximumf %6, %7 : vector<2x128xf32>
    %c0_7 = arith.constant 0 : index
    %c0_8 = arith.constant 0 : index
    %9 = vector.load %arg6[%c0_7, %c0_8] : memref<1x384xf32, #tpu.memory_space<vmem>>, vector<1x128xf32>
    %10 = vector.broadcast %9 : vector<1x128xf32> to vector<2x128xf32>
    %11 = arith.mulf %8, %10 : vector<2x128xf32>
    %cst_9 = arith.constant dense<0.000000e+00> : vector<2xf32>
    %12 = vector.multi_reduction <add>, %11, %cst_9 [1] : vector<2x128xf32> to vector<2xf32>
    %13 = vector.shape_cast %12 : vector<2xf32> to vector<2x1xf32>
    %14 = arith.addf %0, %13 : vector<2x1xf32>
    %c0_10 = arith.constant 0 : index
    %c0_11 = arith.constant 0 : index
    %15 = vector.load %arg2[%c0_10, %c0_11] : memref<2x1024xf32, #tpu.memory_space<vmem>>, vector<2x1024xf32>
    %c2048 = arith.constant 2048 : index
    %c0_12 = arith.constant 0 : index
    %16 = vector.load %arg4[%c2048, %c0_12] : memref<3584x128xf32, #tpu.memory_space<vmem>>, vector<1024x128xf32>
    %cst_13 = arith.constant dense<0.000000e+00> : vector<2x128xf32>
    %17 = tpu.matmul %15, %16, %cst_13 {dimension_numbers = #tpu.dot_dimension_numbers<[1], [0], [0], [1], [0, 0, 1, 1], [], []>} : vector<2x1024xf32>, vector<1024x128xf32>, vector<2x128xf32> -> vector<2x128xf32>
    %c0_14 = arith.constant 0 : index
    %c128 = arith.constant 128 : index
    %18 = vector.load %arg5[%c0_14, %c128] : memref<1x384xf32, #tpu.memory_space<vmem>>, vector<1x128xf32>
    %19 = vector.broadcast %18 : vector<1x128xf32> to vector<2x128xf32>
    %20 = arith.addf %17, %19 : vector<2x128xf32>
    %cst_15 = arith.constant 0.000000e+00 : f32
    %21 = vector.broadcast %cst_15 : f32 to vector<2x128xf32>
    %22 = arith.maximumf %20, %21 : vector<2x128xf32>
    %c0_16 = arith.constant 0 : index
    %c128_17 = arith.constant 128 : index
    %23 = vector.load %arg6[%c0_16, %c128_17] : memref<1x384xf32, #tpu.memory_space<vmem>>, vector<1x128xf32>
    %24 = vector.broadcast %23 : vector<1x128xf32> to vector<2x128xf32>
    %25 = arith.mulf %22, %24 : vector<2x128xf32>
    %cst_18 = arith.constant dense<0.000000e+00> : vector<2xf32>
    %26 = vector.multi_reduction <add>, %25, %cst_18 [1] : vector<2x128xf32> to vector<2xf32>
    %27 = vector.shape_cast %26 : vector<2xf32> to vector<2x1xf32>
    %28 = arith.addf %14, %27 : vector<2x1xf32>
    %c0_19 = arith.constant 0 : index
    %c0_20 = arith.constant 0 : index
    %29 = vector.load %arg3[%c0_19, %c0_20] : memref<2x512xf32, #tpu.memory_space<vmem>>, vector<2x512xf32>
    %c3072 = arith.constant 3072 : index
    %c0_21 = arith.constant 0 : index
    %30 = vector.load %arg4[%c3072, %c0_21] : memref<3584x128xf32, #tpu.memory_space<vmem>>, vector<512x128xf32>
    %cst_22 = arith.constant dense<0.000000e+00> : vector<2x128xf32>
    %31 = tpu.matmul %29, %30, %cst_22 {dimension_numbers = #tpu.dot_dimension_numbers<[1], [0], [0], [1], [0, 0, 1, 1], [], []>} : vector<2x512xf32>, vector<512x128xf32>, vector<2x128xf32> -> vector<2x128xf32>
    %c0_23 = arith.constant 0 : index
    %c256 = arith.constant 256 : index
    %32 = vector.load %arg5[%c0_23, %c256] : memref<1x384xf32, #tpu.memory_space<vmem>>, vector<1x128xf32>
    %33 = vector.broadcast %32 : vector<1x128xf32> to vector<2x128xf32>
    %34 = arith.addf %31, %33 : vector<2x128xf32>
    %cst_24 = arith.constant 0.000000e+00 : f32
    %35 = vector.broadcast %cst_24 : f32 to vector<2x128xf32>
    %36 = arith.maximumf %34, %35 : vector<2x128xf32>
    %c0_25 = arith.constant 0 : index
    %c256_26 = arith.constant 256 : index
    %37 = vector.load %arg6[%c0_25, %c256_26] : memref<1x384xf32, #tpu.memory_space<vmem>>, vector<1x128xf32>
    %38 = vector.broadcast %37 : vector<1x128xf32> to vector<2x128xf32>
    %39 = arith.mulf %36, %38 : vector<2x128xf32>
    %cst_27 = arith.constant dense<0.000000e+00> : vector<2xf32>
    %40 = vector.multi_reduction <add>, %39, %cst_27 [1] : vector<2x128xf32> to vector<2xf32>
    %41 = vector.shape_cast %40 : vector<2xf32> to vector<2x1xf32>
    %42 = arith.addf %28, %41 : vector<2x1xf32>
    %c0_28 = arith.constant 0 : index
    %43 = memref.load %arg7[%c0_28] : memref<1xf32, #tpu.memory_space<smem>>
    %44 = vector.broadcast %43 : f32 to vector<2x1xf32>
    %45 = arith.addf %42, %44 : vector<2x1xf32>
    %c0_29 = arith.constant 0 : index
    %c0_30 = arith.constant 0 : index
    %46 = vector.load %arg8[%c0_29, %c0_30] : memref<2x1xf32, #tpu.memory_space<vmem>>, vector<2x1xf32>
    tpu.vector_store %arg8[%c0_29, %c0_30], %45 {strides = array<i32>} : memref<2x1xf32, #tpu.memory_space<vmem>>, vector<2x1xf32>,
    return
  }
  func.func @transform_0(%arg0: i32) -> (i32, i32) {
    %c0_i32 = arith.constant 0 : i32
    %c0_i32_0 = arith.constant 0 : i32
    return %arg0, %c0_i32 : i32, i32
  }
  func.func @transform_1(%arg0: i32) -> (i32, i32) {
    %c0_i32 = arith.constant 0 : i32
    %c0_i32_0 = arith.constant 0 : i32
    return %arg0, %c0_i32 : i32, i32
  }
  func.func @transform_2(%arg0: i32) -> (i32, i32) {
    %c0_i32 = arith.constant 0 : i32
    %c0_i32_0 = arith.constant 0 : i32
    return %arg0, %c0_i32 : i32, i32
  }
  func.func @transform_3(%arg0: i32) -> (i32, i32) {
    %c0_i32 = arith.constant 0 : i32
    %c0_i32_0 = arith.constant 0 : i32
    %c0_i32_1 = arith.constant 0 : i32
    return %c0_i32, %c0_i32_0 : i32, i32
  }
  func.func @transform_4(%arg0: i32) -> (i32, i32) {
    %c0_i32 = arith.constant 0 : i32
    %c0_i32_0 = arith.constant 0 : i32
    %c0_i32_1 = arith.constant 0 : i32
    return %c0_i32, %c0_i32_0 : i32, i32
  }
  func.func @transform_5(%arg0: i32) -> (i32, i32) {
    %c0_i32 = arith.constant 0 : i32
    %c0_i32_0 = arith.constant 0 : i32
    %c0_i32_1 = arith.constant 0 : i32
    return %c0_i32, %c0_i32_0 : i32, i32
  }
  func.func @transform_6(%arg0: i32) -> i32 {
    %c0_i32 = arith.constant 0 : i32
    %c0_i32_0 = arith.constant 0 : i32
    return %c0_i32 : i32
  }
  func.func @transform_7(%arg0: i32) -> (i32, i32) {
    %c0_i32 = arith.constant 0 : i32
    %c0_i32_0 = arith.constant 0 : i32
    return %arg0, %c0_i32 : i32, i32
  }
}

</mosaic_0001>

<bundles_post_ra>
// kernel: tpu_custom_call.1
= control target key start
LH: loop header
LB: loop body
LE: loop exit
PB: predicated region body
PF: predicated region fallthrough
CT: control target
= control target key end

     0   :  { %13 = vsyncpa [#allocation4], 0  ;;  %s3075_s0 = inlined_call_operand.hbm [shape: f32[2,2048], index: 0, kind: input, shape index: {}]   ;;  %s3076_s1 = inlined_call_operand.hbm [shape: f32[2,1024], index: 1, kind: input, shape index: {}]   ;;  %s3077_s2 = inlined_call_operand.hbm [shape: f32[2,512], index: 2, kind: input, shape index: {}]   ;;  %s3078_s3 = inlined_call_operand.hbm [shape: f32[3584,128], index: 3, kind: input, shape index: {}]   ;;  %s3079_s4 = inlined_call_operand.hbm [shape: f32[1,384], index: 4, kind: input, shape index: {}]   ;;  %s3080_s5 = inlined_call_operand.hbm [shape: f32[1,384], index: 5, kind: input, shape index: {}]   ;;  %s3081_s6 = inlined_call_operand.<no memory space> [shape: f32[1], index: 6, kind: input, shape index: {}]   ;;  %s3082_s7 = inlined_call_operand.vmem [shape: f32[2,1], index: 7, kind: output, shape index: {}]  }
   0x1   :  { %14 = vsyncpa [#allocation6], 0 }
   0x2   :  { %15 = vsyncpa [#allocation9], 0 }
   0x3   :  { %16 = vsyncpa [#allocation12], 0  ;;  %s2862_s24 = smov [#allocation5]   ;;  %s2863_s26 = smov [#allocation8]  }
   0x4   :  { %s33_s25 = sshll.u32 %s2862_s24, 4  ;;  %s52_s27 = sshll.u32 %s2863_s26, 4  ;;  %s34_s25 = int_to_ptr.vmem [resolvable:$true] %s33_s25  ;;  %s2911_s27 = int_to_ptr.vmem [resolvable:$true] %s52_s27 }
   0x5   :  { %s2722_s30 = scalar_lea.hbm %s3076_s1, 256 }
   0x6   :  { %p2723_p0 = scmp.ne.s32.totalorder %s3076_s1, %s2722_s30  ;;  %p2726_p1 = scmp.lt.u32.totalorder %s2722_s30, %s3076_s1 }
   0x8   :  { %p2728_p2 = pnand %p2726_p1, %p2723_p0 }
   0xa   :  { %2731 = shalt.err (!%p2728_p2)
}
   0xb   :  { %s2732_s12 = scalar_lea.vmem %s34_s25, 256  ;;  %p2737_p4 = scmp.lt.s32.totalorder %s34_s25, %s34_s25 }
   0xc   :  { %p2733_p3 = scmp.ne.s32.totalorder %s34_s25, %s2732_s12  ;;  %p2738_p5 = scmp.lt.s32.totalorder %s2732_s12, %s2732_s12 }
   0xe   :  { %p2739_p6 = por %p2738_p5, %p2737_p4 }
  0x10   :  { %p2740_p7 = pnand %p2739_p6, %p2733_p3 }
  0x12   :  { %2743 = shalt.err (!%p2740_p7)
}
  0x13   :  { %36 = dma.hbm_to_vmem [thread:$0]  %s3076_s1, 256, %s34_s25, [#allocation6]  }
  0x14   :  { %s2744_s17 = scalar_lea.hbm %s3078_s3, 57344 }
  0x15   :  { %p2745_p8 = scmp.ne.s32.totalorder %s3078_s3, %s2744_s17  ;;  %p2748_p9 = scmp.lt.u32.totalorder %s2744_s17, %s3078_s3 }
  0x17   :  { %p2750_p10 = pnand %p2748_p9, %p2745_p8 }
  0x19   :  { %2753 = shalt.err (!%p2750_p10)
}
  0x1a   :  { %s2754_s22 = scalar_lea.vmem %s2911_s27, 57344  ;;  %p2759_p12 = scmp.lt.s32.totalorder %s2911_s27, %s2911_s27 }
  0x1b   :  { %p2755_p11 = scmp.ne.s32.totalorder %s2911_s27, %s2754_s22  ;;  %p2760_p13 = scmp.lt.s32.totalorder %s2754_s22, %s2754_s22 }
  0x1d   :  { %p2761_p0 = por %p2760_p13, %p2759_p12 }
  0x1f   :  { %p2762_p1 = pnand %p2761_p0, %p2755_p11 }
  0x21   :  { %2765 = shalt.err (!%p2762_p1)
}
  0x22   :  { %s2864_s1 = smov 128   ;;  %s2865_s23 = smov 8  }
  0x23   :  { %58 = dma.hbm_to_vmem [thread:$0]  %s3078_s3, 57344, %s2911_s27, [#allocation9], %s2864_s1, %s2864_s1, %s2865_s23  }
  0x24   :  { %s2866_s26 = smov [#allocation3]   ;;  %s2867_s29 = smov [#allocation7]  }
  0x25   :  { %s23_s28 = sshll.u32 %s2866_s26, 4  ;;  %s43_s30 = sshll.u32 %s2867_s29, 4  ;;  %s24_s28 = int_to_ptr.vmem [resolvable:$true] %s23_s28  ;;  %s44_s30 = int_to_ptr.vmem [resolvable:$true] %s43_s30 }
  0x26   :  { %s2766_s10 = scalar_lea.hbm %s3075_s0, 512 }
  0x27   :  { %p2767_p2 = scmp.ne.s32.totalorder %s3075_s0, %s2766_s10  ;;  %p2770_p3 = scmp.lt.u32.totalorder %s2766_s10, %s3075_s0 }
  0x29   :  { %p2772_p4 = pnand %p2770_p3, %p2767_p2 }
  0x2b   :  { %2775 = shalt.err (!%p2772_p4)
}
  0x2c   :  { %s2776_s3 = scalar_lea.vmem %s24_s28, 512  ;;  %p2781_p6 = scmp.lt.s32.totalorder %s24_s28, %s24_s28 }
  0x2d   :  { %p2777_p5 = scmp.ne.s32.totalorder %s24_s28, %s2776_s3  ;;  %p2782_p7 = scmp.lt.s32.totalorder %s2776_s3, %s2776_s3 }
  0x2f   :  { %p2783_p8 = por %p2782_p7, %p2781_p6 }
  0x31   :  { %p2784_p9 = pnand %p2783_p8, %p2777_p5 }
  0x33   :  { %2787 = shalt.err (!%p2784_p9)
}
  0x34   :  { %26 = dma.hbm_to_vmem [thread:$0]  %s3075_s0, 512, %s24_s28, [#allocation4]  }
  0x35   :  { %s2788_s18 = scalar_lea.hbm %s3077_s2, 128 }
  0x36   :  { %p2789_p10 = scmp.ne.s32.totalorder %s3077_s2, %s2788_s18  ;;  %p2792_p11 = scmp.lt.u32.totalorder %s2788_s18, %s3077_s2 }
  0x38   :  { %p2794_p12 = pnand %p2792_p11, %p2789_p10 }
  0x3a   :  { %2797 = shalt.err (!%p2794_p12)
}
  0x3b   :  { %s2798_s1 = scalar_lea.vmem %s44_s30, 128  ;;  %p2803_p0 = scmp.lt.s32.totalorder %s44_s30, %s44_s30 }
  0x3c   :  { %p2799_p13 = scmp.ne.s32.totalorder %s44_s30, %s2798_s1  ;;  %p2804_p1 = scmp.lt.s32.totalorder %s2798_s1, %s2798_s1 }
  0x3e   :  { %p2805_p2 = por %p2804_p1, %p2803_p0 }
  0x40   :  { %p2806_p3 = pnand %p2805_p2, %p2799_p13 }
  0x42   :  { %2809 = shalt.err (!%p2806_p3)
}
  0x43   :  { %46 = dma.hbm_to_vmem [thread:$0]  %s3077_s2, 128, %s44_s30, [#allocation6]  }
  0x44   :  { %s2868_s24 = smov [#allocation10]   ;;  %s2869_s26 = smov [#allocation11]  }
  0x45   :  { %s65_s25 = sshll.u32 %s2868_s24, 4  ;;  %s75_s28 = sshll.u32 %s2869_s26, 4  ;;  %s66_s25 = int_to_ptr.vmem [resolvable:$true] %s65_s25  ;;  %s76_s28 = int_to_ptr.vmem [resolvable:$true] %s75_s28 }
  0x46   :  { %s2810_s9 = scalar_lea.hbm %s3079_s4, 48 }
  0x47   :  { %p2811_p4 = scmp.ne.s32.totalorder %s3079_s4, %s2810_s9  ;;  %p2814_p5 = scmp.lt.u32.totalorder %s2810_s9, %s3079_s4 }
  0x49   :  { %p2816_p6 = pnand %p2814_p5, %p2811_p4 }
  0x4b   :  { %2819 = shalt.err (!%p2816_p6)
}
  0x4c   :  { %s2820_s2 = scalar_lea.vmem %s66_s25, 48  ;;  %s2824_s30 = scalar_lea.vmem %s66_s25, 64 }
  0x4d   :  { %p2821_p7 = scmp.ne.s32.totalorder %s66_s25, %s2820_s2  ;;  %p2825_p8 = scmp.lt.s32.totalorder %s66_s25, %s66_s25 }
  0x4e   :  { %p2826_p9 = scmp.lt.s32.totalorder %s2824_s30, %s2820_s2 }
  0x50   :  { %p2827_p10 = por %p2826_p9, %p2825_p8 }
  0x52   :  { %p2828_p11 = pnand %p2827_p10, %p2821_p7 }
  0x54   :  { %2831 = shalt.err (!%p2828_p11)
}
  0x55   :  { %68 = dma.hbm_to_vmem [thread:$0]  %s3079_s4, 48, %s66_s25, [#allocation9]  }
  0x56   :  { %s2832_s16 = scalar_lea.hbm %s3080_s5, 48 }
  0x57   :  { %p2833_p12 = scmp.ne.s32.totalorder %s3080_s5, %s2832_s16  ;;  %p2836_p13 = scmp.lt.u32.totalorder %s2832_s16, %s3080_s5 }
  0x59   :  { %p2838_p0 = pnand %p2836_p13, %p2833_p12 }
  0x5b   :  { %2841 = shalt.err (!%p2838_p0)
}
  0x5c   :  { %s2842_s21 = scalar_lea.vmem %s76_s28, 48  ;;  %s2846_s22 = scalar_lea.vmem %s76_s28, 64 }
  0x5d   :  { %p2843_p1 = scmp.ne.s32.totalorder %s76_s28, %s2842_s21  ;;  %p2847_p2 = scmp.lt.s32.totalorder %s76_s28, %s76_s28 }
  0x5e   :  { %p2848_p3 = scmp.lt.s32.totalorder %s2846_s22, %s2842_s21 }
  0x60   :  { %p2849_p4 = por %p2848_p3, %p2847_p2 }
  0x62   :  { %p2850_p5 = pnand %p2849_p4, %p2843_p1 }
  0x64   :  { %2853 = shalt.err (!%p2850_p5)
}
  0x65   :  { %78 = dma.hbm_to_vmem [thread:$0]  %s3080_s5, 48, %s76_s28, [#allocation12]  }
  0x66   :  { %2854 = dma.done.wait [#allocation4], 512  }
  0x67   :  { %2855 = vsyncadd [#allocation4], 4294966784 }
  0x68   :  { %2856 = dma.done.wait [#allocation6], 384  }
  0x69   :  { %2857 = vsyncadd [#allocation6], 4294966912 }
  0x6a   :  { %2858 = dma.done.wait [#allocation9], 57392  }
  0x6b   :  { %2859 = vsyncadd [#allocation9], 4294909904 }
  0x6c   :  { %2860 = dma.done.wait [#allocation12], 48  }
  0x6d   :  { %2861 = vsyncadd [#allocation12], 4294967248  ;;  %v119_v0 = vld [vmem:[#allocation8 + $0x80] sm:$0xff]  ;;  %v120_v1 = vld [vmem:[#allocation8 + $0x88] sm:$0xff]  ;;  %v2870_v47 = vmov 1983009808   ;;  %v374_v49 = vlaneseq }
  0x6e   :  { %v103_v2 = vld [vmem:[#allocation8] sm:$0xff]  ;;  %v2258_v3 = vpack.c.bf16 %v120_v1, %v119_v0  ;;  %v104_v4 = vld [vmem:[#allocation8 + $0x8] sm:$0xff]  ;;  %v121_v11 = vld [vmem:[#allocation8 + $0x90] sm:$0xff]  ;;  %v372_v48 = vunpack.c.l.s4 %v2870_v47  ;;  %vm1023_vm0 = vcmask 1041408   ;;  %vm1752_vm1 = vcmask 1024  }
  0x6f   :  { %v151_v5 = vld [vmem:[#allocation8 + $0x180] sm:$0xff]  ;;  %v152_v6 = vld [vmem:[#allocation8 + $0x188] sm:$0xff]  ;;  %v2260_v7 = vpack.c.bf16 %v104_v4, %v103_v2  ;;  %v122_v13 = vld [vmem:[#allocation8 + $0x98] sm:$0xff]  ;;  %v375_v0 = vshrl.u32 %v374_v49, 7 }
  0x70   :  { %v2290_v8 = vpack.c.bf16 %v152_v6, %v151_v5  ;;  %v135_v9 = vld [vmem:[#allocation8 + $0x100] sm:$0xff]  ;;  %v136_v10 = vld [vmem:[#allocation8 + $0x108] sm:$0xff]  ;;  %2259 = vmatprep.subr.bf16.mxu0 %v2258_v3  ;;  %v105_v14 = vld [vmem:[#allocation8 + $0x10] sm:$0xff]  ;;  %v2262_v16 = vpack.c.bf16 %v122_v13, %v121_v11  ;;  %v373_v63 = vunpack.c.0.s8 %v372_v48 }
  0x71   :  { %v2292_v12 = vpack.c.bf16 %v136_v10, %v135_v9  ;;  %v106_v15 = vld [vmem:[#allocation8 + $0x18] sm:$0xff]  ;;  %2261 = vmatpush3.bf16.msra.mxu0 %v2260_v7  ;;  %v153_v18 = vld [vmem:[#allocation8 + $0x190] sm:$0xff]  ;;  %v123_v23 = vld [vmem:[#allocation8 + $0xa0] sm:$0xff] }
  0x72   :  { %2291 = vmatprep.subr.bf16.mxu1 %v2290_v8  ;;  %v2264_v17 = vpack.c.bf16 %v106_v15, %v105_v14  ;;  %v154_v19 = vld [vmem:[#allocation8 + $0x198] sm:$0xff]  ;;  %v137_v20 = vld [vmem:[#allocation8 + $0x110] sm:$0xff]  ;;  %v124_v24 = vld [vmem:[#allocation8 + $0xa8] sm:$0xff]  ;;  %2263 = vmatprep.subr.bf16.mxu0 %v2262_v16  ;;  %v2990_v13 = vsub.s32 %v373_v63, %v375_v0 }
  0x73   :  { %2293 = vmatpush3.bf16.msra.mxu1 %v2292_v12  ;;  %v2294_v21 = vpack.c.bf16 %v154_v19, %v153_v18  ;;  %v138_v22 = vld [vmem:[#allocation8 + $0x118] sm:$0xff]  ;;  %v2266_v26 = vpack.c.bf16 %v124_v24, %v123_v23  ;;  %v107_v27 = vld [vmem:[#allocation8 + $0x20] sm:$0xff]  ;;  %v108_v28 = vld [vmem:[#allocation8 + $0x28] sm:$0xff] }
  0x74   :  { %v2296_v25 = vpack.c.bf16 %v138_v22, %v137_v20  ;;  %v155_v29 = vld [vmem:[#allocation8 + $0x1a0] sm:$0xff]  ;;  %v156_v30 = vld [vmem:[#allocation8 + $0x1a8] sm:$0xff]  ;;  %v2268_v33 = vpack.c.bf16 %v108_v28, %v107_v27  ;;  %v125_v35 = vld [vmem:[#allocation8 + $0xb0] sm:$0xff] }
  0x75   :  { %2295 = vmatprep.subr.bf16.mxu1 %v2294_v21  ;;  %v139_v31 = vld [vmem:[#allocation8 + $0x120] sm:$0xff]  ;;  %v140_v32 = vld [vmem:[#allocation8 + $0x128] sm:$0xff]  ;;  %2265 = vmatpush3.bf16.msra.mxu0 %v2264_v17  ;;  %v2298_v34 = vpack.c.bf16 %v156_v30, %v155_v29  ;;  %v126_v36 = vld [vmem:[#allocation8 + $0xb8] sm:$0xff] }
  0x76   :  { %v109_v37 = vld [vmem:[#allocation8 + $0x30] sm:$0xff]  ;;  %2267 = vmatprep.subr.bf16.mxu0 %v2266_v26  ;;  %v2300_v38 = vpack.c.bf16 %v140_v32, %v139_v31  ;;  %v2270_v39 = vpack.c.bf16 %v126_v36, %v125_v35  ;;  %v110_v40 = vld [vmem:[#allocation8 + $0x38] sm:$0xff]  ;;  %v127_v46 = vld [vmem:[#allocation8 + $0xc0] sm:$0xff] }
  0x77   :  { %2297 = vmatpush3.bf16.msra.mxu1 %v2296_v25  ;;  %v157_v41 = vld [vmem:[#allocation8 + $0x1b0] sm:$0xff]  ;;  %v158_v42 = vld [vmem:[#allocation8 + $0x1b8] sm:$0xff]  ;;  %v128_v50 = vld [vmem:[#allocation8 + $0xc8] sm:$0xff]  ;;  %v2272_v51 = vpack.c.bf16 %v110_v40, %v109_v37 }
  0x78   :  { %2299 = vmatprep.subr.bf16.mxu1 %v2298_v34  ;;  %v2302_v43 = vpack.c.bf16 %v158_v42, %v157_v41  ;;  %v141_v44 = vld [vmem:[#allocation8 + $0x130] sm:$0xff]  ;;  %v142_v45 = vld [vmem:[#allocation8 + $0x138] sm:$0xff]  ;;  %v159_v52 = vld [vmem:[#allocation8 + $0x1c0] sm:$0xff]  ;;  %v2274_v55 = vpack.c.bf16 %v128_v50, %v127_v46 }
  0x79   :  { %2269 = vmatpush3.bf16.msra.mxu0 %v2268_v33  ;;  %v160_v53 = vld [vmem:[#allocation8 + $0x1c8] sm:$0xff]  ;;  %v2304_v54 = vpack.c.bf16 %v142_v45, %v141_v44  ;;  %v111_v56 = vld [vmem:[#allocation8 + $0x40] sm:$0xff]  ;;  %v129_v61 = vld [vmem:[#allocation8 + $0xd0] sm:$0xff] }
  0x7a   :  { %2271 = vmatprep.subr.bf16.mxu0 %v2270_v39  ;;  %v112_v57 = vld [vmem:[#allocation8 + $0x48] sm:$0xff]  ;;  %v143_v58 = vld [vmem:[#allocation8 + $0x140] sm:$0xff]  ;;  %v2306_v59 = vpack.c.bf16 %v160_v53, %v159_v52  ;;  %v130_v62 = vld [vmem:[#allocation8 + $0xd8] sm:$0xff] }
  0x7b   :  { %2301 = vmatpush3.bf16.msra.mxu1 %v2300_v38  ;;  %v144_v60 = vld [vmem:[#allocation8 + $0x148] sm:$0xff]  ;;  %v161_v1 = vld [vmem:[#allocation8 + $0x1d0] sm:$0xff]  ;;  %v162_v2 = vld [vmem:[#allocation8 + $0x1d8] sm:$0xff]  ;;  %v2276_v3 = vpack.c.bf16 %v112_v57, %v111_v56  ;;  %v2278_v5 = vpack.c.bf16 %v130_v62, %v129_v61 }
  0x7c   :  { %2303 = vmatprep.subr.bf16.mxu1 %v2302_v43  ;;  %v2308_v4 = vpack.c.bf16 %v144_v60, %v143_v58  ;;  %v113_v6 = vld [vmem:[#allocation8 + $0x50] sm:$0xff]  ;;  %v114_v7 = vld [vmem:[#allocation8 + $0x58] sm:$0xff]  ;;  %v2310_v9 = vpack.c.bf16 %v162_v2, %v161_v1  ;;  %v131_v11 = vld [vmem:[#allocation8 + $0xe0] sm:$0xff] }
  0x7d   :  { %2273 = vmatpush3.bf16.msra.mxu0 %v2272_v51  ;;  %v145_v8 = vld [vmem:[#allocation8 + $0x150] sm:$0xff]  ;;  %v146_v10 = vld [vmem:[#allocation8 + $0x158] sm:$0xff]  ;;  %v132_v12 = vld [vmem:[#allocation8 + $0xe8] sm:$0xff]  ;;  %v2280_v16 = vpack.c.bf16 %v114_v7, %v113_v6 }
  0x7e   :  { %2275 = vmatprep.subr.bf16.mxu0 %v2274_v55  ;;  %v163_v14 = vld [vmem:[#allocation8 + $0x1e0] sm:$0xff]  ;;  %v164_v15 = vld [vmem:[#allocation8 + $0x1e8] sm:$0xff]  ;;  %v2312_v18 = vpack.c.bf16 %v146_v10, %v145_v8  ;;  %v2282_v19 = vpack.c.bf16 %v132_v12, %v131_v11  ;;  %v133_v25 = vld [vmem:[#allocation8 + $0xf0] sm:$0xff] }
  0x7f   :  { %2305 = vmatpush3.bf16.msra.mxu1 %v2304_v54  ;;  %v115_v17 = vld [vmem:[#allocation8 + $0x60] sm:$0xff]  ;;  %v116_v20 = vld [vmem:[#allocation8 + $0x68] sm:$0xff]  ;;  %v2314_v23 = vpack.c.bf16 %v164_v15, %v163_v14  ;;  %v134_v26 = vld [vmem:[#allocation8 + $0xf8] sm:$0xff] }
  0x80   :  { %2307 = vmatprep.subr.bf16.mxu1 %v2306_v59  ;;  %v147_v21 = vld [vmem:[#allocation8 + $0x160] sm:$0xff]  ;;  %v99_v22 = vld [vmem:[#allocation3] sm:$0xff]  ;;  %v165_v29 = vld [vmem:[#allocation8 + $0x1f0] sm:$0xff]  ;;  %v2284_v31 = vpack.c.bf16 %v116_v20, %v115_v17  ;;  %v2286_v35 = vpack.c.bf16 %v134_v26, %v133_v25 }
  0x81   :  { %2277 = vmatpush3.bf16.msra.mxu0 %v2276_v3  ;;  %v148_v24 = vld [vmem:[#allocation8 + $0x168] sm:$0xff]  ;;  %v377_v27 = vrot.slane %v99_v22, %v2990_v13  ;;  %v370_v28 = vcombine.high %v99_v22, %v99_v22  ;;  %v166_v30 = vld [vmem:[#allocation8 + $0x1f8] sm:$0xff]  ;;  %v117_v36 = vld [vmem:[#allocation8 + $0x70] sm:$0xff] }
  0x82   :  { %2279 = vmatprep.subr.bf16.mxu0 %v2278_v5  ;;  %v2316_v34 = vpack.c.bf16 %v148_v24, %v147_v21  ;;  %v118_v37 = vld [vmem:[#allocation8 + $0x78] sm:$0xff]  ;;  %v149_v38 = vld [vmem:[#allocation8 + $0x170] sm:$0xff]  ;;  %v2318_v39 = vpack.c.bf16 %v166_v30, %v165_v29  ;;  %v183_v41 = vld [vmem:[#allocation8 + $0x280] sm:$0xff] }
  0x83   :  { %2309 = vmatpush3.bf16.msra.mxu1 %v2308_v4  ;;  %v385_v32 = vcombine.high %v377_v27, %v377_v27  ;;  %v384_v33 = vrot.slane %v370_v28, %v2990_v13  ;;  %v150_v40 = vld [vmem:[#allocation8 + $0x178] sm:$0xff]  ;;  %v184_v42 = vld [vmem:[#allocation8 + $0x288] sm:$0xff]  ;;  %v215_v44 = vld [vmem:[#allocation8 + $0x380] sm:$0xff]  ;;  %v2288_v46 = vpack.c.bf16 %v118_v37, %v117_v36 }
  0x84   :  { %2311 = vmatprep.subr.bf16.mxu1 %v2310_v9  ;;  %v216_v45 = vld [vmem:[#allocation8 + $0x388] sm:$0xff]  ;;  %v2320_v47 = vpack.c.bf16 %v150_v40, %v149_v38  ;;  %v2322_v48 = vpack.c.bf16 %v184_v42, %v183_v41  ;;  %v167_v49 = vld [vmem:[#allocation8 + $0x200] sm:$0xff]  ;;  %v185_v54 = vld [vmem:[#allocation8 + $0x290] sm:$0xff] }
  0x85   :  { %2281 = vmatpush3.bf16.msra.mxu0 %v2280_v16  ;;  %518 = vmatprep.mubr.f32.mxu0 %v385_v32  ;;  %v386_v43 = vcombine.high %v384_v33, %v384_v33  ;;  %v168_v50 = vld [vmem:[#allocation8 + $0x208] sm:$0xff]  ;;  %v199_v51 = vld [vmem:[#allocation8 + $0x300] sm:$0xff]  ;;  %v2354_v52 = vpack.c.bf16 %v216_v45, %v215_v44  ;;  %v186_v55 = vld [vmem:[#allocation8 + $0x298] sm:$0xff] }
  0x86   :  { %2283 = vmatprep.subr.bf16.mxu0 %v2282_v19  ;;  %v200_v53 = vld [vmem:[#allocation8 + $0x308] sm:$0xff]  ;;  %v217_v56 = vld [vmem:[#allocation8 + $0x390] sm:$0xff]  ;;  %v218_v57 = vld [vmem:[#allocation8 + $0x398] sm:$0xff]  ;;  %v2324_v58 = vpack.c.bf16 %v168_v50, %v167_v49  ;;  %v2326_v60 = vpack.c.bf16 %v186_v55, %v185_v54 }
  0x87   :  { %2313 = vmatpush3.bf16.msra.mxu1 %v2312_v18  ;;  %588 = vmatprep.mubr.f32.mxu1 %v386_v43  ;;  %v2356_v59 = vpack.c.bf16 %v200_v53, %v199_v51  ;;  %v169_v61 = vld [vmem:[#allocation8 + $0x210] sm:$0xff]  ;;  %v170_v62 = vld [vmem:[#allocation8 + $0x218] sm:$0xff]  ;;  %v2358_v0 = vpack.c.bf16 %v218_v57, %v217_v56  ;;  %v187_v2 = vld [vmem:[#allocation8 + $0x2a0] sm:$0xff] }
  0x88   :  { %2315 = vmatprep.subr.bf16.mxu1 %v2314_v23  ;;  %v201_v63 = vld [vmem:[#allocation8 + $0x310] sm:$0xff]  ;;  %v202_v1 = vld [vmem:[#allocation8 + $0x318] sm:$0xff]  ;;  %v188_v3 = vld [vmem:[#allocation8 + $0x2a8] sm:$0xff]  ;;  %v2328_v6 = vpack.c.bf16 %v170_v62, %v169_v61 }
  0x89   :  { %2285 = vmatpush3.bf16.msra.mxu0 %v2284_v31  ;;  %v219_v4 = vld [vmem:[#allocation8 + $0x3a0] sm:$0xff]  ;;  %v220_v5 = vld [vmem:[#allocation8 + $0x3a8] sm:$0xff]  ;;  %v2360_v7 = vpack.c.bf16 %v202_v1, %v201_v63  ;;  %v2330_v8 = vpack.c.bf16 %v188_v3, %v187_v2  ;;  %v189_v15 = vld [vmem:[#allocation8 + $0x2b0] sm:$0xff] }
  0x8a   :  { %2287 = vmatprep.subr.bf16.mxu0 %v2286_v35  ;;  %v171_v9 = vld [vmem:[#allocation8 + $0x220] sm:$0xff]  ;;  %v172_v10 = vld [vmem:[#allocation8 + $0x228] sm:$0xff]  ;;  %v2362_v12 = vpack.c.bf16 %v220_v5, %v219_v4  ;;  %v190_v16 = vld [vmem:[#allocation8 + $0x2b8] sm:$0xff] }
  0x8b   :  { %2317 = vmatpush3.bf16.msra.mxu1 %v2316_v34  ;;  %v203_v11 = vld [vmem:[#allocation8 + $0x320] sm:$0xff]  ;;  %v204_v14 = vld [vmem:[#allocation8 + $0x328] sm:$0xff]  ;;  %v221_v17 = vld [vmem:[#allocation8 + $0x3b0] sm:$0xff]  ;;  %v2332_v19 = vpack.c.bf16 %v172_v10, %v171_v9  ;;  %v2334_v21 = vpack.c.bf16 %v190_v16, %v189_v15 }
  0x8c   :  { %2319 = vmatprep.subr.bf16.mxu1 %v2318_v39  ;;  %v222_v18 = vld [vmem:[#allocation8 + $0x3b8] sm:$0xff]  ;;  %v2364_v20 = vpack.c.bf16 %v204_v14, %v203_v11  ;;  %v173_v22 = vld [vmem:[#allocation8 + $0x230] sm:$0xff]  ;;  %v192_v28 = vld [vmem:[#allocation8 + $0x2c8] sm:$0xff] }
  0x8d   :  { %2289 = vmatpush3.bf16.msra.mxu0 %v2288_v46  ;;  %v174_v23 = vld [vmem:[#allocation8 + $0x238] sm:$0xff]  ;;  %v205_v24 = vld [vmem:[#allocation8 + $0x330] sm:$0xff]  ;;  %v2366_v25 = vpack.c.bf16 %v222_v18, %v221_v17  ;;  %v223_v29 = vld [vmem:[#allocation8 + $0x3c0] sm:$0xff] }
  0x8e   :  { %2323 = vmatprep.subr.bf16.mxu0 %v2322_v48  ;;  %v206_v26 = vld [vmem:[#allocation8 + $0x338] sm:$0xff]  ;;  %v224_v30 = vld [vmem:[#allocation8 + $0x3c8] sm:$0xff]  ;;  %v100_v31 = vld [vmem:[#allocation3 + $0x8] sm:$0xff]  ;;  %v2336_v32 = vpack.c.bf16 %v174_v23, %v173_v22 }
  0x8f   :  { %2321 = vmatpush3.bf16.msra.mxu1 %v2320_v47  ;;  %v387_v34 = vcombine.high %v100_v31, %v100_v31  ;;  %v2368_v35 = vpack.c.bf16 %v206_v26, %v205_v24  ;;  %v175_v37 = vld [vmem:[#allocation8 + $0x240] sm:$0xff]  ;;  %v176_v38 = vld [vmem:[#allocation8 + $0x248] sm:$0xff]  ;;  %v2370_v40 = vpack.c.bf16 %v224_v30, %v223_v29  ;;  %v193_v42 = vld [vmem:[#allocation8 + $0x2d0] sm:$0xff] }
  0x90   :  { %2355 = vmatprep.subr.bf16.mxu1 %v2354_v52  ;;  %519 = vmatmul.mubr.f32.vlgmr.msra.gmra.mrb[0].mxu0 %v377_v27  ;;  %v191_v27 = vld [vmem:[#allocation8 + $0x2c0] sm:$0xff]  ;;  %v208_v41 = vld [vmem:[#allocation8 + $0x348] sm:$0xff]  ;;  %v194_v43 = vld [vmem:[#allocation8 + $0x2d8] sm:$0xff]  ;;  %v2340_v48 = vpack.c.bf16 %v176_v38, %v175_v37 }
  0x91   :  { %2325 = vmatpush3.bf16.msra.mxu0 %v2324_v58  ;;  %v2338_v36 = vpack.c.bf16 %v192_v28, %v191_v27  ;;  %v207_v39 = vld [vmem:[#allocation8 + $0x340] sm:$0xff]  ;;  %v3000_v45 = vrot.slane %v387_v34, %v2990_v13  ;;  %v225_v46 = vld [vmem:[#allocation8 + $0x3d0] sm:$0xff]  ;;  %v226_v47 = vld [vmem:[#allocation8 + $0x3d8] sm:$0xff]  ;;  %v2342_v51 = vpack.c.bf16 %v194_v43, %v193_v42 }
  0x92   :  { %589 = vmatmul.mubr.f32.vlgmr.msra.gmra.mrb[0].mxu1 %v384_v33  ;;  %2327 = vmatprep.subr.bf16.mxu0 %v2326_v60  ;;  %v2995_v33 = vrot.slane %v100_v31, %v2990_v13  ;;  %v2372_v50 = vpack.c.bf16 %v208_v41, %v207_v39  ;;  %v177_v52 = vld [vmem:[#allocation8 + $0x250] sm:$0xff]  ;;  %v178_v53 = vld [vmem:[#allocation8 + $0x258] sm:$0xff]  ;;  %v2374_v55 = vpack.c.bf16 %v226_v47, %v225_v46  ;;  %v195_v57 = vld [vmem:[#allocation8 + $0x2e0] sm:$0xff] }
  0x93   :  { %2357 = vmatpush3.bf16.msra.mxu1 %v2356_v59  ;;  %v403_v49 = vcombine.high %v3000_v45, %v3000_v45  ;;  %v209_v54 = vld [vmem:[#allocation8 + $0x350] sm:$0xff]  ;;  %v210_v56 = vld [vmem:[#allocation8 + $0x358] sm:$0xff]  ;;  %v196_v58 = vld [vmem:[#allocation8 + $0x2e8] sm:$0xff]  ;;  %v2344_v61 = vpack.c.bf16 %v178_v53, %v177_v52 }
  0x94   :  { %2359 = vmatprep.subr.bf16.mxu1 %v2358_v0  ;;  %v402_v44 = vcombine.high %v2995_v33, %v2995_v33  ;;  %v227_v59 = vld [vmem:[#allocation8 + $0x3e0] sm:$0xff]  ;;  %v228_v60 = vld [vmem:[#allocation8 + $0x3e8] sm:$0xff]  ;;  %v2376_v62 = vpack.c.bf16 %v210_v56, %v209_v54  ;;  %v2346_v63 = vpack.c.bf16 %v196_v58, %v195_v57  ;;  %v197_v5 = vld [vmem:[#allocation8 + $0x2f0] sm:$0xff] }
  0x95   :  { %2329 = vmatpush3.bf16.msra.mxu0 %v2328_v6  ;;  %728 = vmatprep.mubr.f32.mxu1 %v403_v49  ;;  %v179_v0 = vld [vmem:[#allocation8 + $0x260] sm:$0xff]  ;;  %v180_v1 = vld [vmem:[#allocation8 + $0x268] sm:$0xff]  ;;  %v2378_v3 = vpack.c.bf16 %v228_v60, %v227_v59  ;;  %v198_v6 = vld [vmem:[#allocation8 + $0x2f8] sm:$0xff] }
  0x96   :  { %2331 = vmatprep.subr.bf16.mxu0 %v2330_v8  ;;  %658 = vmatprep.mubr.f32.mxu0 %v402_v44  ;;  %v211_v2 = vld [vmem:[#allocation8 + $0x360] sm:$0xff]  ;;  %v212_v4 = vld [vmem:[#allocation8 + $0x368] sm:$0xff]  ;;  %v230_v8 = vld [vmem:[#allocation8 + $0x3f8] sm:$0xff]  ;;  %v2348_v9 = vpack.c.bf16 %v180_v1, %v179_v0  ;;  %v2350_v11 = vpack.c.bf16 %v198_v6, %v197_v5 }
  0x97   :  { %2361 = vmatpush3.bf16.msra.mxu1 %v2360_v7  ;;  %v229_v7 = vld [vmem:[#allocation8 + $0x3f0] sm:$0xff]  ;;  %v2380_v10 = vpack.c.bf16 %v212_v4, %v211_v2  ;;  %v182_v14 = vld [vmem:[#allocation8 + $0x278] sm:$0xff]  ;;  %v247_v18 = vld [vmem:[#allocation8 + $0x480] sm:$0xff] }
  0x98   :  { %2363 = vmatprep.subr.bf16.mxu1 %v2362_v12  ;;  %v181_v12 = vld [vmem:[#allocation8 + $0x270] sm:$0xff]  ;;  %v2382_v16 = vpack.c.bf16 %v230_v8, %v229_v7  ;;  %v214_v17 = vld [vmem:[#allocation8 + $0x378] sm:$0xff]  ;;  %v231_v23 = vld [vmem:[#allocation8 + $0x400] sm:$0xff] }
  0x99   :  { %2333 = vmatpush3.bf16.msra.mxu0 %v2332_v19  ;;  %v213_v15 = vld [vmem:[#allocation8 + $0x370] sm:$0xff]  ;;  %v248_v19 = vld [vmem:[#allocation8 + $0x488] sm:$0xff]  ;;  %v2352_v22 = vpack.c.bf16 %v182_v14, %v181_v12  ;;  %v263_v27 = vld [vmem:[#allocation8 + $0x500] sm:$0xff] }
  0x9a   :  { %2335 = vmatprep.subr.bf16.mxu0 %v2334_v21  ;;  %v280_v21 = vld [vmem:[#allocation8 + $0x588] sm:$0xff]  ;;  %v2384_v24 = vpack.c.bf16 %v214_v17, %v213_v15  ;;  %v249_v30 = vld [vmem:[#allocation8 + $0x490] sm:$0xff]  ;;  %v250_v31 = vld [vmem:[#allocation8 + $0x498] sm:$0xff] }
  0x9b   :  { %2365 = vmatpush3.bf16.msra.mxu1 %v2364_v20  ;;  %v279_v20 = vld [vmem:[#allocation8 + $0x580] sm:$0xff]  ;;  %v232_v26 = vld [vmem:[#allocation8 + $0x408] sm:$0xff]  ;;  %v282_v34 = vld [vmem:[#allocation8 + $0x598] sm:$0xff]  ;;  %v2390_v38 = vpack.c.bf16 %v250_v31, %v249_v30 }
  0x9c   :  { %2367 = vmatprep.subr.bf16.mxu1 %v2366_v25  ;;  %v2386_v25 = vpack.c.bf16 %v248_v19, %v247_v18  ;;  %v264_v28 = vld [vmem:[#allocation8 + $0x508] sm:$0xff]  ;;  %v2418_v29 = vpack.c.bf16 %v280_v21, %v279_v20  ;;  %v101_v37 = vld [vmem:[#allocation3 + $0x10] sm:$0xff]  ;;  %v233_v39 = vld [vmem:[#allocation8 + $0x410] sm:$0xff] }
  0x9d   :  { %2337 = vmatpush3.bf16.msra.mxu0 %v2336_v32  ;;  %v281_v32 = vld [vmem:[#allocation8 + $0x590] sm:$0xff]  ;;  %v3005_v42 = vrot.slane %v101_v37, %v2990_v13  ;;  %v404_v43 = vcombine.high %v101_v37, %v101_v37  ;;  %v266_v46 = vld [vmem:[#allocation8 + $0x518] sm:$0xff]  ;;  %v251_v47 = vld [vmem:[#allocation8 + $0x4a0] sm:$0xff] }
  0x9e   :  { %2339 = vmatprep.subr.bf16.mxu0 %v2338_v36  ;;  %v2420_v36 = vpack.c.bf16 %v264_v28, %v263_v27  ;;  %v265_v41 = vld [vmem:[#allocation8 + $0x510] sm:$0xff]  ;;  %v2422_v44 = vpack.c.bf16 %v282_v34, %v281_v32  ;;  %v283_v49 = vld [vmem:[#allocation8 + $0x5a0] sm:$0xff]  ;;  %v236_v57 = vld [vmem:[#allocation8 + $0x428] sm:$0xff] }
  0x9f   :  { %2369 = vmatpush3.bf16.msra.mxu1 %v2368_v35  ;;  %v2388_v35 = vpack.c.bf16 %v232_v26, %v231_v23  ;;  %v3011_v52 = vrot.slane %v404_v43, %v2990_v13  ;;  %v2424_v54 = vpack.c.bf16 %v266_v46, %v265_v41  ;;  %v235_v56 = vld [vmem:[#allocation8 + $0x420] sm:$0xff]  ;;  %v268_v60 = vld [vmem:[#allocation8 + $0x528] sm:$0xff]  ;;  %v286_v0 = vld [vmem:[#allocation8 + $0x5b8] sm:$0xff] }
  0xa0   :  { %2371 = vmatprep.subr.bf16.mxu1 %v2370_v40  ;;  %v234_v40 = vld [vmem:[#allocation8 + $0x418] sm:$0xff]  ;;  %v267_v58 = vld [vmem:[#allocation8 + $0x520] sm:$0xff]  ;;  %v269_v5 = vld [vmem:[#allocation8 + $0x530] sm:$0xff] }
  0xa1   :  { %2341 = vmatpush3.bf16.msra.mxu0 %v2340_v48  ;;  %v252_v48 = vld [vmem:[#allocation8 + $0x4a8] sm:$0xff]  ;;  %v2392_v53 = vpack.c.bf16 %v234_v40, %v233_v39  ;;  %v2428_v1 = vpack.c.bf16 %v268_v60, %v267_v58  ;;  %v238_v4 = vld [vmem:[#allocation8 + $0x438] sm:$0xff]  ;;  %v255_v8 = vld [vmem:[#allocation8 + $0x4c0] sm:$0xff] }
  0xa2   :  { %2343 = vmatprep.subr.bf16.mxu0 %v2342_v51  ;;  %v419_v51 = vcombine.high %v3005_v42, %v3005_v42  ;;  %v270_v7 = vld [vmem:[#allocation8 + $0x538] sm:$0xff]  ;;  %v240_v17 = vld [vmem:[#allocation8 + $0x448] sm:$0xff]  ;;  %v271_v18 = vld [vmem:[#allocation8 + $0x540] sm:$0xff] }
  0xa3   :  { %2373 = vmatpush3.bf16.msra.mxu1 %v2372_v50  ;;  %v284_v50 = vld [vmem:[#allocation8 + $0x5a8] sm:$0xff]  ;;  %v2432_v14 = vpack.c.bf16 %v270_v7, %v269_v5  ;;  %v257_v21 = vld [vmem:[#allocation8 + $0x4d0] sm:$0xff]  ;;  %v274_v32 = vld [vmem:[#allocation8 + $0x558] sm:$0xff] }
  0xa4   :  { %2375 = vmatprep.subr.bf16.mxu1 %v2374_v55  ;;  %v2394_v55 = vpack.c.bf16 %v252_v48, %v251_v47  ;;  %v2426_v59 = vpack.c.bf16 %v284_v50, %v283_v49  ;;  %v272_v20 = vld [vmem:[#allocation8 + $0x548] sm:$0xff]  ;;  %v289_v23 = vld [vmem:[#allocation8 + $0x5d0] sm:$0xff]  ;;  %v259_v34 = vld [vmem:[#allocation8 + $0x4e0] sm:$0xff] }
  0xa5   :  { %2345 = vmatpush3.bf16.msra.mxu0 %v2344_v61  ;;  %v253_v61 = vld [vmem:[#allocation8 + $0x4b0] sm:$0xff]  ;;  %v2436_v26 = vpack.c.bf16 %v272_v20, %v271_v18  ;;  %v292_v37 = vld [vmem:[#allocation8 + $0x5e8] sm:$0xff]  ;;  %v243_v41 = vld [vmem:[#allocation8 + $0x460] sm:$0xff] }
  0xa6   :  { %2347 = vmatprep.subr.bf16.mxu0 %v2346_v63  ;;  %v285_v63 = vld [vmem:[#allocation8 + $0x5b0] sm:$0xff]  ;;  %v244_v43 = vld [vmem:[#allocation8 + $0x468] sm:$0xff]  ;;  %v262_v49 = vld [vmem:[#allocation8 + $0x4f8] sm:$0xff] }
  0xa7   :  { %2377 = vmatpush3.bf16.msra.mxu1 %v2376_v62  ;;  %v254_v62 = vld [vmem:[#allocation8 + $0x4b8] sm:$0xff]  ;;  %v2430_v6 = vpack.c.bf16 %v286_v0, %v285_v63  ;;  %v241_v28 = vld [vmem:[#allocation8 + $0x450] sm:$0xff]  ;;  %v276_v47 = vld [vmem:[#allocation8 + $0x568] sm:$0xff] }
  0xa8   :  { %2379 = vmatprep.subr.bf16.mxu1 %v2378_v3  ;;  %v2398_v2 = vpack.c.bf16 %v254_v62, %v253_v61  ;;  %v237_v3 = vld [vmem:[#allocation8 + $0x430] sm:$0xff]  ;;  %v246_v58 = vld [vmem:[#allocation8 + $0x478] sm:$0xff]  ;;  %v311_v61 = vld [vmem:[#allocation8 + $0x680] sm:$0xff] }
  0xa9   :  { %2349 = vmatpush3.bf16.msra.mxu0 %v2348_v9  ;;  %v256_v9 = vld [vmem:[#allocation8 + $0x4c8] sm:$0xff]  ;;  %v2400_v12 = vpack.c.bf16 %v238_v4, %v237_v3  ;;  %v273_v30 = vld [vmem:[#allocation8 + $0x550] sm:$0xff]  ;;  %v278_v60 = vld [vmem:[#allocation8 + $0x578] sm:$0xff] }
  0xaa   :  { %2351 = vmatprep.subr.bf16.mxu0 %v2350_v11  ;;  %v288_v11 = vld [vmem:[#allocation8 + $0x5c8] sm:$0xff]  ;;  %v2402_v15 = vpack.c.bf16 %v256_v9, %v255_v8  ;;  %v2440_v39 = vpack.c.bf16 %v274_v32, %v273_v30  ;;  %v261_v48 = vld [vmem:[#allocation8 + $0x4f0] sm:$0xff]  ;;  %v343_v63 = vld [vmem:[#allocation8 + $0x780] sm:$0xff] }
  0xab   :  { %2381 = vmatpush3.bf16.msra.mxu1 %v2380_v10  ;;  %v287_v10 = vld [vmem:[#allocation8 + $0x5c0] sm:$0xff]  ;;  %v293_v50 = vld [vmem:[#allocation8 + $0x5f0] sm:$0xff]  ;;  %v312_v62 = vld [vmem:[#allocation8 + $0x688] sm:$0xff] }
  0xac   :  { %2383 = vmatprep.subr.bf16.mxu1 %v2382_v16  ;;  %v239_v16 = vld [vmem:[#allocation8 + $0x440] sm:$0xff]  ;;  %v2434_v19 = vpack.c.bf16 %v288_v11, %v287_v10  ;;  %v344_v0 = vld [vmem:[#allocation8 + $0x788] sm:$0xff]  ;;  %v2450_v3 = vpack.c.bf16 %v312_v62, %v311_v61  ;;  %v313_v9 = vld [vmem:[#allocation8 + $0x690] sm:$0xff] }
  0xad   :  { %2353 = vmatpush3.bf16.msra.mxu0 %v2352_v22  ;;  %v258_v22 = vld [vmem:[#allocation8 + $0x4d8] sm:$0xff]  ;;  %v295_v4 = vld [vmem:[#allocation8 + $0x600] sm:$0xff]  ;;  %v296_v5 = vld [vmem:[#allocation8 + $0x608] sm:$0xff]  ;;  %v2482_v7 = vpack.c.bf16 %v344_v0, %v343_v63 }
  0xae   :  { %2387 = vmatprep.subr.bf16.mxu0 %v2386_v25  ;;  %v2404_v25 = vpack.c.bf16 %v240_v17, %v239_v16  ;;  %v2406_v27 = vpack.c.bf16 %v258_v22, %v257_v21  ;;  %v328_v8 = vld [vmem:[#allocation8 + $0x708] sm:$0xff]  ;;  %v314_v10 = vld [vmem:[#allocation8 + $0x698] sm:$0xff]  ;;  %v2452_v16 = vpack.c.bf16 %v296_v5, %v295_v4  ;;  %v329_v21 = vld [vmem:[#allocation8 + $0x710] sm:$0xff] }
  0xaf   :  { %2385 = vmatpush3.bf16.msra.mxu1 %v2384_v24  ;;  %v290_v24 = vld [vmem:[#allocation8 + $0x5d8] sm:$0xff]  ;;  %v2454_v18 = vpack.c.bf16 %v314_v10, %v313_v9  ;;  %v336_v62 = vld [vmem:[#allocation8 + $0x748] sm:$0xff]  ;;  %v321_v63 = vld [vmem:[#allocation8 + $0x6d0] sm:$0xff] }
  0xb0   :  { %2419 = vmatprep.subr.bf16.mxu1 %v2418_v29  ;;  %659 = vmatmul.mubr.f32.vlgmr.msra.gmra.mrb[2].mxu0 %v2995_v33  ;;  %v420_v33 = vcombine.high %v3011_v52, %v3011_v52  ;;  %v242_v29 = vld [vmem:[#allocation8 + $0x458] sm:$0xff]  ;;  %v2438_v31 = vpack.c.bf16 %v290_v24, %v289_v23  ;;  %v315_v24 = vld [vmem:[#allocation8 + $0x6a0] sm:$0xff]  ;;  %v305_v5 = vld [vmem:[#allocation8 + $0x650] sm:$0xff] }
  0xb1   :  { %2389 = vmatpush3.bf16.msra.mxu0 %v2388_v35  ;;  %798 = vmatprep.mubr.f32.mxu0 %v419_v51  ;;  %v260_v35 = vld [vmem:[#allocation8 + $0x4e8] sm:$0xff]  ;;  %v294_v51 = vld [vmem:[#allocation8 + $0x5f8] sm:$0xff]  ;;  %v323_v10 = vld [vmem:[#allocation8 + $0x6e0] sm:$0xff] }
  0xb2   :  { %729 = vmatmul.mubr.f32.vlgmr.msra.gmra.mrb[2].mxu1 %v3000_v45  ;;  %2391 = vmatprep.subr.bf16.mxu0 %v2390_v38  ;;  %v2396_v45 = vpack.c.bf16 %v236_v57, %v235_v56  ;;  %v2408_v38 = vpack.c.bf16 %v242_v29, %v241_v28  ;;  %v2410_v40 = vpack.c.bf16 %v260_v35, %v259_v34  ;;  %v245_v57 = vld [vmem:[#allocation8 + $0x470] sm:$0xff]  ;;  %v298_v20 = vld [vmem:[#allocation8 + $0x618] sm:$0xff]  ;;  %v348_v28 = vld [vmem:[#allocation8 + $0x7a8] sm:$0xff] }
  0xb3   :  { %2421 = vmatpush3.bf16.msra.mxu1 %v2420_v36  ;;  %868 = vmatprep.mubr.f32.mxu1 %v420_v33  ;;  %v291_v36 = vld [vmem:[#allocation8 + $0x5e0] sm:$0xff]  ;;  %v2414_v56 = vpack.c.bf16 %v262_v49, %v261_v48  ;;  %v277_v33 = vld [vmem:[#allocation8 + $0x570] sm:$0xff]  ;;  %v330_v23 = vld [vmem:[#allocation8 + $0x718] sm:$0xff] }
  0xb4   :  { %2423 = vmatprep.subr.bf16.mxu1 %v2422_v44  ;;  %v275_v44 = vld [vmem:[#allocation8 + $0x560] sm:$0xff]  ;;  %v2442_v46 = vpack.c.bf16 %v292_v37, %v291_v36  ;;  %v300_v35 = vld [vmem:[#allocation8 + $0x628] sm:$0xff]  ;;  %v333_v48 = vld [vmem:[#allocation8 + $0x730] sm:$0xff] }
  0xb5   :  { %2393 = vmatpush3.bf16.msra.mxu0 %v2392_v53  ;;  %v2412_v53 = vpack.c.bf16 %v244_v43, %v243_v41  ;;  %v299_v34 = vld [vmem:[#allocation8 + $0x620] sm:$0xff]  ;;  %v350_v41 = vld [vmem:[#allocation8 + $0x7b8] sm:$0xff] }
  0xb6   :  { %2395 = vmatprep.subr.bf16.mxu0 %v2394_v55  ;;  %v2444_v55 = vpack.c.bf16 %v276_v47, %v275_v44  ;;  %v331_v36 = vld [vmem:[#allocation8 + $0x720] sm:$0xff]  ;;  %v2460_v43 = vpack.c.bf16 %v300_v35, %v299_v34  ;;  %v302_v47 = vld [vmem:[#allocation8 + $0x638] sm:$0xff]  ;;  %v309_v34 = vld [vmem:[#allocation8 + $0x670] sm:$0xff] }
  0xb7   :  { %2425 = vmatpush3.bf16.msra.mxu1 %v2424_v54  ;;  %v102_v54 = vld [vmem:[#allocation3 + $0x18] sm:$0xff]  ;;  %v322_v0 = vld [vmem:[#allocation8 + $0x6d8] sm:$0xff] }
  0xb8   :  { %2427 = vmatprep.subr.bf16.mxu1 %v2426_v59  ;;  %v2446_v59 = vpack.c.bf16 %v294_v51, %v293_v50  ;;  %v3017_v11 = vrot.slane %v102_v54, %v2990_v13  ;;  %v334_v50 = vld [vmem:[#allocation8 + $0x738] sm:$0xff]  ;;  %v319_v51 = vld [vmem:[#allocation8 + $0x6c0] sm:$0xff]  ;;  %v2470_v4 = vpack.c.bf16 %v322_v0, %v321_v63  ;;  %v1064_v63 = vld [vmem:[#allocation8 + $0x910] sm:$0xff] }
  0xb9   :  { %2397 = vmatpush3.bf16.msra.mxu0 %v2396_v45  ;;  %v421_v45 = vcombine.high %v102_v54, %v102_v54  ;;  %v351_v54 = vld [vmem:[#allocation8 + $0x7c0] sm:$0xff]  ;;  %v338_v9 = vld [vmem:[#allocation8 + $0x758] sm:$0xff] }
  0xba   :  { %2399 = vmatprep.subr.bf16.mxu0 %v2398_v2  ;;  %v2448_v2 = vpack.c.bf16 %v278_v60, %v277_v33  ;;  %v303_v33 = vld [vmem:[#allocation8 + $0x640] sm:$0xff]  ;;  %v310_v35 = vld [vmem:[#allocation8 + $0x678] sm:$0xff] }
  0xbb   :  { %2429 = vmatpush3.bf16.msra.mxu1 %v2428_v1  ;;  %v2416_v1 = vpack.c.bf16 %v246_v58, %v245_v57  ;;  %v2496_v57 = vpack.c.bf16 %v334_v50, %v333_v48  ;;  %v335_v60 = vld [vmem:[#allocation8 + $0x740] sm:$0xff]  ;;  %v1031_v48 = vld [vmem:[#allocation8 + $0x808] sm:$0xff] }
  0xbc   :  { %2431 = vmatprep.subr.bf16.mxu1 %v2430_v6  ;;  %v327_v6 = vld [vmem:[#allocation8 + $0x700] sm:$0xff] }
  0xbd   :  { %2401 = vmatpush3.bf16.msra.mxu0 %v2400_v12  ;;  %v345_v12 = vld [vmem:[#allocation8 + $0x790] sm:$0xff]  ;;  %v2484_v17 = vpack.c.bf16 %v328_v8, %v327_v6  ;;  %v306_v6 = vld [vmem:[#allocation8 + $0x658] sm:$0xff] }
  0xbe   :  { %2403 = vmatprep.subr.bf16.mxu0 %v2402_v15  ;;  %v3020_v15 = vrot.slane %v421_v45, %v2990_v13  ;;  %v353_v45 = vld [vmem:[#allocation8 + $0x7d0] sm:$0xff] }
  0xbf   :  { %2433 = vmatpush3.bf16.msra.mxu1 %v2432_v14  ;;  %v346_v14 = vld [vmem:[#allocation8 + $0x798] sm:$0xff] }
  0xc0   :  { %2435 = vmatprep.subr.bf16.mxu1 %v2434_v19  ;;  %v297_v19 = vld [vmem:[#allocation8 + $0x610] sm:$0xff]  ;;  %v2486_v22 = vpack.c.bf16 %v346_v14, %v345_v12  ;;  %v437_v29 = vcombine.high %v3020_v15, %v3020_v15  ;;  %v324_v12 = vld [vmem:[#allocation8 + $0x6e8] sm:$0xff]  ;;  %v355_v14 = vld [vmem:[#allocation8 + $0x7e0] sm:$0xff] }
  0xc1   :  { %2405 = vmatpush3.bf16.msra.mxu0 %v2404_v25  ;;  %v316_v25 = vld [vmem:[#allocation8 + $0x6a8] sm:$0xff]  ;;  %v2456_v30 = vpack.c.bf16 %v298_v20, %v297_v19  ;;  %v2474_v19 = vpack.c.bf16 %v324_v12, %v323_v10  ;;  %v307_v20 = vld [vmem:[#allocation8 + $0x660] sm:$0xff] }
  0xc2   :  { %2407 = vmatprep.subr.bf16.mxu0 %v2406_v27  ;;  %v347_v27 = vld [vmem:[#allocation8 + $0x7a0] sm:$0xff]  ;;  %v2458_v32 = vpack.c.bf16 %v316_v25, %v315_v24  ;;  %v340_v24 = vld [vmem:[#allocation8 + $0x768] sm:$0xff]  ;;  %v325_v25 = vld [vmem:[#allocation8 + $0x6f0] sm:$0xff] }
  0xc3   :  { %2437 = vmatpush3.bf16.msra.mxu1 %v2436_v26  ;;  %v436_v26 = vcombine.high %v3017_v11, %v3017_v11  ;;  %v2490_v37 = vpack.c.bf16 %v348_v28, %v347_v27  ;;  %v357_v27 = vld [vmem:[#allocation8 + $0x7f0] sm:$0xff]  ;;  %v358_v28 = vld [vmem:[#allocation8 + $0x7f8] sm:$0xff]  ;;  %v1034_v10 = vld [vmem:[#allocation8 + $0x820] sm:$0xff] }
  0xc4   :  { %2439 = vmatprep.subr.bf16.mxu1 %v2438_v31  ;;  %v2488_v31 = vpack.c.bf16 %v330_v23, %v329_v21  ;;  %v308_v21 = vld [vmem:[#allocation8 + $0x668] sm:$0xff] }
  0xc5   :  { %2409 = vmatpush3.bf16.msra.mxu0 %v2408_v38  ;;  %v332_v38 = vld [vmem:[#allocation8 + $0x728] sm:$0xff] }
  0xc6   :  { %2411 = vmatprep.subr.bf16.mxu0 %v2410_v40  ;;  %v349_v40 = vld [vmem:[#allocation8 + $0x7b0] sm:$0xff]  ;;  %v1035_v12 = vld [vmem:[#allocation8 + $0x828] sm:$0xff] }
  0xc7   :  { %2441 = vmatpush3.bf16.msra.mxu1 %v2440_v39  ;;  %v318_v39 = vld [vmem:[#allocation8 + $0x6b8] sm:$0xff]  ;;  %v2494_v49 = vpack.c.bf16 %v350_v41, %v349_v40  ;;  %v1078_v40 = vld [vmem:[#allocation8 + $0x980] sm:$0xff]  ;;  %v1079_v41 = vld [vmem:[#allocation8 + $0x988] sm:$0xff] }
  0xc8   :  { %2443 = vmatprep.subr.bf16.mxu1 %v2442_v46  ;;  %v301_v46 = vld [vmem:[#allocation8 + $0x630] sm:$0xff]  ;;  %v2546_v50 = vpack.c.bf16 %v1079_v41, %v1078_v40  ;;  %v1057_v41 = vld [vmem:[#allocation8 + $0x8d8] sm:$0xff] }
  0xc9   :  { %2413 = vmatpush3.bf16.msra.mxu0 %v2412_v53  ;;  %v320_v53 = vld [vmem:[#allocation8 + $0x6c8] sm:$0xff]  ;;  %v1056_v40 = vld [vmem:[#allocation8 + $0x8d0] sm:$0xff] }
  0xca   :  { %2415 = vmatprep.subr.bf16.mxu0 %v2414_v56  ;;  %v2464_v56 = vpack.c.bf16 %v302_v47, %v301_v46  ;;  %v2466_v58 = vpack.c.bf16 %v320_v53, %v319_v51  ;;  %v1030_v47 = vld [vmem:[#allocation8 + $0x800] sm:$0xff]  ;;  %v1063_v51 = vld [vmem:[#allocation8 + $0x908] sm:$0xff]  ;;  %v1048_v53 = vld [vmem:[#allocation8 + $0x890] sm:$0xff] }
  0xcb   :  { %2445 = vmatpush3.bf16.msra.mxu1 %v2444_v55  ;;  %v352_v55 = vld [vmem:[#allocation8 + $0x7c8] sm:$0xff] }
  0xcc   :  { %2447 = vmatprep.subr.bf16.mxu1 %v2446_v59  ;;  %v304_v59 = vld [vmem:[#allocation8 + $0x648] sm:$0xff]  ;;  %v2498_v61 = vpack.c.bf16 %v352_v55, %v351_v54  ;;  %v1049_v54 = vld [vmem:[#allocation8 + $0x898] sm:$0xff] }
  0xcd   :  { %2417 = vmatpush3.bf16.msra.mxu0 %v2416_v1  ;;  %v354_v1 = vld [vmem:[#allocation8 + $0x7d8] sm:$0xff] }
  0xce   :  { %2451 = vmatprep.subr.bf16.mxu0 %v2450_v3  ;;  %v2500_v3 = vpack.c.bf16 %v336_v62, %v335_v60  ;;  %v2502_v8 = vpack.c.bf16 %v354_v1, %v353_v45  ;;  %v2518_v60 = vpack.c.bf16 %v1049_v54, %v1048_v53  ;;  %v1033_v62 = vld [vmem:[#allocation8 + $0x818] sm:$0xff]  ;;  %v1050_v1 = vld [vmem:[#allocation8 + $0x8a0] sm:$0xff] }
  0xcf   :  { %2449 = vmatpush3.bf16.msra.mxu1 %v2448_v2  ;;  %v2468_v2 = vpack.c.bf16 %v304_v59, %v303_v33  ;;  %v2516_v33 = vpack.c.bf16 %v1031_v48, %v1030_v47  ;;  %v1065_v45 = vld [vmem:[#allocation8 + $0x918] sm:$0xff]  ;;  %v2534_v47 = vpack.c.bf16 %v1057_v41, %v1056_v40  ;;  %v1040_v48 = vld [vmem:[#allocation8 + $0x850] sm:$0xff]  ;;  %v1058_v54 = vld [vmem:[#allocation8 + $0x8e0] sm:$0xff] }
  0xd0   :  { %2483 = vmatprep.subr.bf16.mxu1 %v2482_v7  ;;  %799 = vmatmul.mubr.f32.vlgmr.msra.gmra.mrb[4].mxu0 %v3005_v42  ;;  %v317_v42 = vld [vmem:[#allocation8 + $0x6b0] sm:$0xff]  ;;  %v1073_v53 = vld [vmem:[#allocation8 + $0x958] sm:$0xff] }
  0xd1   :  { %2453 = vmatpush3.bf16.msra.mxu0 %v2452_v16  ;;  %938 = vmatprep.mubr.f32.mxu0 %v436_v26  ;;  %v2462_v44 = vpack.c.bf16 %v318_v39, %v317_v42  ;;  %v337_v7 = vld [vmem:[#allocation8 + $0x750] sm:$0xff]  ;;  %v356_v16 = vld [vmem:[#allocation8 + $0x7e8] sm:$0xff]  ;;  %v326_v26 = vld [vmem:[#allocation8 + $0x6f8] sm:$0xff] }
  0xd2   :  { %869 = vmatmul.mubr.f32.vlgmr.msra.gmra.mrb[4].mxu1 %v3011_v52  ;;  %2455 = vmatprep.subr.bf16.mxu0 %v2454_v18  ;;  %v2492_v52 = vpack.c.bf16 %v332_v38, %v331_v36  ;;  %v2504_v18 = vpack.c.bf16 %v338_v9, %v337_v7  ;;  %v2506_v23 = vpack.c.bf16 %v356_v16, %v355_v14  ;;  %v341_v36 = vld [vmem:[#allocation8 + $0x770] sm:$0xff]  ;;  %v342_v38 = vld [vmem:[#allocation8 + $0x778] sm:$0xff]  ;;  %v1046_v42 = vld [vmem:[#allocation8 + $0x880] sm:$0xff] }
  0xd3   :  { %2485 = vmatpush3.bf16.msra.mxu1 %v2484_v17  ;;  %1008 = vmatprep.mubr.f32.mxu1 %v437_v29  ;;  %v2472_v17 = vpack.c.bf16 %v306_v6, %v305_v5  ;;  %v2476_v29 = vpack.c.bf16 %v308_v21, %v307_v20  ;;  %v1047_v39 = vld [vmem:[#allocation8 + $0x888] sm:$0xff]  ;;  %v1066_v14 = vld [vmem:[#allocation8 + $0x920] sm:$0xff]  ;;  %v1085_v20 = vld [vmem:[#allocation8 + $0x9b8] sm:$0xff]  ;;  %v2524_v21 = vpack.c.bf16 %v1035_v12, %v1034_v10 }
  0xd4   :  { %2487 = vmatprep.subr.bf16.mxu1 %v2486_v22  ;;  %v339_v22 = vld [vmem:[#allocation8 + $0x760] sm:$0xff]  ;;  %v2514_v46 = vpack.c.bf16 %v1047_v39, %v1046_v42  ;;  %v1083_v5 = vld [vmem:[#allocation8 + $0x9a8] sm:$0xff]  ;;  %v1044_v10 = vld [vmem:[#allocation8 + $0x870] sm:$0xff] }
  0xd5   :  { %2457 = vmatpush3.bf16.msra.mxu0 %v2456_v30  ;;  %v1028_v30 = vld [vmem:[#allocation5] sm:$0xff]  ;;  %v1045_v12 = vld [vmem:[#allocation8 + $0x878] sm:$0xff]  ;;  %v1128_v40 = vld [vmem:[#allocation8 + $0xb10] sm:$0xff] }
  0xd6   :  { %2459 = vmatprep.subr.bf16.mxu0 %v2458_v32  ;;  %v2478_v32 = vpack.c.bf16 %v326_v26, %v325_v25  ;;  %v3029_v55 = vrot.slane %v1028_v30, %v2990_v13  ;;  %v1068_v25 = vld [vmem:[#allocation8 + $0x930] sm:$0xff]  ;;  %v1071_v39 = vld [vmem:[#allocation8 + $0x948] sm:$0xff] }
  0xd7   :  { %2489 = vmatpush3.bf16.msra.mxu1 %v2488_v31  ;;  %v2508_v31 = vpack.c.bf16 %v340_v24, %v339_v22  ;;  %v1037_v24 = vld [vmem:[#allocation8 + $0x838] sm:$0xff] }
  0xd8   :  { %2491 = vmatprep.subr.bf16.mxu1 %v2490_v37  ;;  %v2510_v37 = vpack.c.bf16 %v358_v28, %v357_v27  ;;  %v1069_v27 = vld [vmem:[#allocation8 + $0x938] sm:$0xff]  ;;  %v1054_v28 = vld [vmem:[#allocation8 + $0x8c0] sm:$0xff] }
  0xd9   :  { %2461 = vmatpush3.bf16.msra.mxu0 %v2460_v43  ;;  %v1167_v43 = vcombine.high %v1028_v30, %v1028_v30  ;;  %v1086_v30 = vld [vmem:[#allocation8 + $0x9c0] sm:$0xff] }
  0xda   :  { %2463 = vmatprep.subr.bf16.mxu0 %v2462_v44  ;;  %v2512_v44 = vpack.c.bf16 %v342_v38, %v341_v36  ;;  %v1038_v36 = vld [vmem:[#allocation8 + $0x840] sm:$0xff] }
  0xdb   :  { %2493 = vmatpush3.bf16.msra.mxu1 %v2492_v52  ;;  %v2480_v52 = vpack.c.bf16 %v310_v35, %v309_v34  ;;  %v2560_v34 = vpack.c.bf16 %v1069_v27, %v1068_v25  ;;  %v1070_v38 = vld [vmem:[#allocation8 + $0x940] sm:$0xff]  ;;  %v1095_v25 = vld [vmem:[#allocation8 + $0xa08] sm:$0xff] }
  0xdc   :  { %2495 = vmatprep.subr.bf16.mxu1 %v2494_v49  ;;  %v1062_v49 = vld [vmem:[#allocation8 + $0x900] sm:$0xff] }
  0xdd   :  { %2465 = vmatpush3.bf16.msra.mxu0 %v2464_v56  ;;  %v1080_v56 = vld [vmem:[#allocation8 + $0x990] sm:$0xff]  ;;  %v2548_v59 = vpack.c.bf16 %v1063_v51, %v1062_v49  ;;  %v1041_v49 = vld [vmem:[#allocation8 + $0x858] sm:$0xff] }
  0xde   :  { %2467 = vmatprep.subr.bf16.mxu0 %v2466_v58  ;;  %v3032_v58 = vrot.slane %v1167_v43, %v2990_v13  ;;  %v1088_v43 = vld [vmem:[#allocation8 + $0x9d0] sm:$0xff] }
  0xdf   :  { %2497 = vmatpush3.bf16.msra.mxu1 %v2496_v57  ;;  %v1081_v57 = vld [vmem:[#allocation8 + $0x998] sm:$0xff] }
  0xe0   :  { %2499 = vmatprep.subr.bf16.mxu1 %v2498_v61  ;;  %v1032_v61 = vld [vmem:[#allocation8 + $0x810] sm:$0xff]  ;;  %v2550_v0 = vpack.c.bf16 %v1081_v57, %v1080_v56  ;;  %v1183_v6 = vcombine.high %v3032_v58, %v3032_v58  ;;  %v1059_v56 = vld [vmem:[#allocation8 + $0x8e8] sm:$0xff]  ;;  %v1090_v57 = vld [vmem:[#allocation8 + $0x9e0] sm:$0xff] }
  0xe1   :  { %2469 = vmatpush3.bf16.msra.mxu0 %v2468_v2  ;;  %v1051_v2 = vld [vmem:[#allocation8 + $0x8a8] sm:$0xff]  ;;  %v2520_v7 = vpack.c.bf16 %v1033_v62, %v1032_v61  ;;  %v2538_v61 = vpack.c.bf16 %v1059_v56, %v1058_v54  ;;  %v1042_v62 = vld [vmem:[#allocation8 + $0x860] sm:$0xff] }
  0xe2   :  { %2471 = vmatprep.subr.bf16.mxu0 %v2470_v4  ;;  %v1082_v4 = vld [vmem:[#allocation8 + $0x9a0] sm:$0xff]  ;;  %v2522_v9 = vpack.c.bf16 %v1051_v2, %v1050_v1  ;;  %v1075_v1 = vld [vmem:[#allocation8 + $0x968] sm:$0xff]  ;;  %v1060_v2 = vld [vmem:[#allocation8 + $0x8f0] sm:$0xff] }
  0xe3   :  { %2501 = vmatpush3.bf16.msra.mxu1 %v2500_v3  ;;  %v1182_v3 = vcombine.high %v3029_v55, %v3029_v55  ;;  %v2554_v16 = vpack.c.bf16 %v1083_v5, %v1082_v4  ;;  %v1092_v4 = vld [vmem:[#allocation8 + $0x9f0] sm:$0xff]  ;;  %v1093_v5 = vld [vmem:[#allocation8 + $0x9f8] sm:$0xff]  ;;  %v1098_v54 = vld [vmem:[#allocation8 + $0xa20] sm:$0xff] }
  0xe4   :  { %2503 = vmatprep.subr.bf16.mxu1 %v2502_v8  ;;  %v2552_v8 = vpack.c.bf16 %v1065_v45, %v1064_v63  ;;  %v1043_v63 = vld [vmem:[#allocation8 + $0x868] sm:$0xff] }
  0xe5   :  { %2473 = vmatpush3.bf16.msra.mxu0 %v2472_v17  ;;  %v1067_v17 = vld [vmem:[#allocation8 + $0x928] sm:$0xff] }
  0xe6   :  { %2475 = vmatprep.subr.bf16.mxu0 %v2474_v19  ;;  %v1084_v19 = vld [vmem:[#allocation8 + $0x9b0] sm:$0xff]  ;;  %v1099_v56 = vld [vmem:[#allocation8 + $0xa28] sm:$0xff] }
  0xe7   :  { %2505 = vmatpush3.bf16.msra.mxu1 %v2504_v18  ;;  %v1053_v18 = vld [vmem:[#allocation8 + $0x8b8] sm:$0xff]  ;;  %v2558_v26 = vpack.c.bf16 %v1085_v20, %v1084_v19  ;;  %v1142_v19 = vld [vmem:[#allocation8 + $0xb80] sm:$0xff]  ;;  %v1143_v20 = vld [vmem:[#allocation8 + $0xb88] sm:$0xff] }
  0xe8   :  { %2507 = vmatprep.subr.bf16.mxu1 %v2506_v23  ;;  %v1036_v23 = vld [vmem:[#allocation8 + $0x830] sm:$0xff]  ;;  %v2610_v27 = vpack.c.bf16 %v1143_v20, %v1142_v19  ;;  %v1121_v20 = vld [vmem:[#allocation8 + $0xad8] sm:$0xff] }
  0xe9   :  { %2477 = vmatpush3.bf16.msra.mxu0 %v2476_v29  ;;  %v1055_v29 = vld [vmem:[#allocation8 + $0x8c8] sm:$0xff]  ;;  %v1120_v19 = vld [vmem:[#allocation8 + $0xad0] sm:$0xff] }
  0xea   :  { %2479 = vmatprep.subr.bf16.mxu0 %v2478_v32  ;;  %v2528_v32 = vpack.c.bf16 %v1037_v24, %v1036_v23  ;;  %v2530_v35 = vpack.c.bf16 %v1055_v29, %v1054_v28  ;;  %v1094_v24 = vld [vmem:[#allocation8 + $0xa00] sm:$0xff]  ;;  %v1127_v28 = vld [vmem:[#allocation8 + $0xb08] sm:$0xff]  ;;  %v1112_v29 = vld [vmem:[#allocation8 + $0xa90] sm:$0xff] }
  0xeb   :  { %2509 = vmatpush3.bf16.msra.mxu1 %v2508_v31  ;;  %v1087_v31 = vld [vmem:[#allocation8 + $0x9c8] sm:$0xff] }
  0xec   :  { %2511 = vmatprep.subr.bf16.mxu1 %v2510_v37  ;;  %v1039_v37 = vld [vmem:[#allocation8 + $0x848] sm:$0xff]  ;;  %v2562_v42 = vpack.c.bf16 %v1087_v31, %v1086_v30  ;;  %v1113_v30 = vld [vmem:[#allocation8 + $0xa98] sm:$0xff] }
  0xed   :  { %2481 = vmatpush3.bf16.msra.mxu0 %v2480_v52  ;;  %v1089_v52 = vld [vmem:[#allocation8 + $0x9d8] sm:$0xff] }
  0xee   :  { %2515 = vmatprep.subr.bf16.mxu0 %v2514_v46  ;;  %v2564_v46 = vpack.c.bf16 %v1071_v39, %v1070_v38  ;;  %v2566_v51 = vpack.c.bf16 %v1089_v52, %v1088_v43  ;;  %v2582_v38 = vpack.c.bf16 %v1113_v30, %v1112_v29  ;;  %v1097_v39 = vld [vmem:[#allocation8 + $0xa18] sm:$0xff]  ;;  %v1114_v52 = vld [vmem:[#allocation8 + $0xaa0] sm:$0xff] }
  0xef   :  { %2513 = vmatpush3.bf16.msra.mxu1 %v2512_v44  ;;  %v2532_v44 = vpack.c.bf16 %v1039_v37, %v1038_v36  ;;  %v2580_v36 = vpack.c.bf16 %v1095_v25, %v1094_v24  ;;  %v1129_v43 = vld [vmem:[#allocation8 + $0xb18] sm:$0xff]  ;;  %v2598_v24 = vpack.c.bf16 %v1121_v20, %v1120_v19  ;;  %v1104_v25 = vld [vmem:[#allocation8 + $0xa50] sm:$0xff]  ;;  %v1122_v30 = vld [vmem:[#allocation8 + $0xae0] sm:$0xff] }
  0xf0   :  { %2547 = vmatprep.subr.bf16.mxu1 %v2546_v50  ;;  %939 = vmatmul.mubr.f32.vlgmr.msra.gmra.mrb[6].mxu0 %v3017_v11  ;;  %v1052_v11 = vld [vmem:[#allocation8 + $0x8b0] sm:$0xff]  ;;  %v1137_v29 = vld [vmem:[#allocation8 + $0xb58] sm:$0xff] }
  0xf1   :  { %2517 = vmatpush3.bf16.msra.mxu0 %v2516_v33  ;;  %1273 = vmatprep.mubr.f32.mxu0 %v1182_v3  ;;  %v2526_v22 = vpack.c.bf16 %v1053_v18, %v1052_v11  ;;  %v1072_v50 = vld [vmem:[#allocation8 + $0x950] sm:$0xff]  ;;  %v1091_v33 = vld [vmem:[#allocation8 + $0x9e8] sm:$0xff]  ;;  %v1061_v3 = vld [vmem:[#allocation8 + $0x8f8] sm:$0xff] }
  0xf2   :  { %1009 = vmatmul.mubr.f32.vlgmr.msra.gmra.mrb[6].mxu1 %v3020_v15  ;;  %2519 = vmatprep.subr.bf16.mxu0 %v2518_v60  ;;  %v2556_v15 = vpack.c.bf16 %v1067_v17, %v1066_v14  ;;  %v2568_v60 = vpack.c.bf16 %v1073_v53, %v1072_v50  ;;  %v2570_v45 = vpack.c.bf16 %v1091_v33, %v1090_v57  ;;  %v1076_v14 = vld [vmem:[#allocation8 + $0x970] sm:$0xff]  ;;  %v1077_v17 = vld [vmem:[#allocation8 + $0x978] sm:$0xff]  ;;  %v1110_v11 = vld [vmem:[#allocation8 + $0xa80] sm:$0xff] }
  0xf3   :  { %2549 = vmatpush3.bf16.msra.mxu1 %v2548_v59  ;;  %1343 = vmatprep.mubr.f32.mxu1 %v1183_v6  ;;  %v2536_v59 = vpack.c.bf16 %v1041_v49, %v1040_v48  ;;  %v2540_v6 = vpack.c.bf16 %v1043_v63, %v1042_v62  ;;  %v1111_v18 = vld [vmem:[#allocation8 + $0xa88] sm:$0xff]  ;;  %v1130_v57 = vld [vmem:[#allocation8 + $0xb20] sm:$0xff]  ;;  %v1149_v62 = vld [vmem:[#allocation8 + $0xbb8] sm:$0xff]  ;;  %v2588_v63 = vpack.c.bf16 %v1099_v56, %v1098_v54 }
  0xf4   :  { %2551 = vmatprep.subr.bf16.mxu1 %v2550_v0  ;;  %v1074_v0 = vld [vmem:[#allocation8 + $0x960] sm:$0xff]  ;;  %v2578_v23 = vpack.c.bf16 %v1111_v18, %v1110_v11  ;;  %v1147_v48 = vld [vmem:[#allocation8 + $0xba8] sm:$0xff]  ;;  %v1108_v54 = vld [vmem:[#allocation8 + $0xa70] sm:$0xff] }
  0xf5   :  { %2521 = vmatpush3.bf16.msra.mxu0 %v2520_v7  ;;  %v1029_v7 = vld [vmem:[#allocation5 + $0x8] sm:$0xff]  ;;  %v1135_v18 = vld [vmem:[#allocation8 + $0xb48] sm:$0xff]  ;;  %v1109_v56 = vld [vmem:[#allocation8 + $0xa78] sm:$0xff] }
  0xf6   :  { %2523 = vmatprep.subr.bf16.mxu0 %v2522_v9  ;;  %v2542_v9 = vpack.c.bf16 %v1061_v3, %v1060_v2  ;;  %v3041_v31 = vrot.slane %v1029_v7, %v2990_v13  ;;  %v1132_v2 = vld [vmem:[#allocation8 + $0xb30] sm:$0xff] }
  0xf7   :  { %2553 = vmatpush3.bf16.msra.mxu1 %v2552_v8  ;;  %v2572_v8 = vpack.c.bf16 %v1075_v1, %v1074_v0  ;;  %v1101_v1 = vld [vmem:[#allocation8 + $0xa38] sm:$0xff]  ;;  %v1537_v19 = vld [vmem:[#allocation8 + $0xd10] sm:$0xff] }
  0xf8   :  { %2555 = vmatprep.subr.bf16.mxu1 %v2554_v16  ;;  %v2574_v16 = vpack.c.bf16 %v1093_v5, %v1092_v4  ;;  %v1133_v4 = vld [vmem:[#allocation8 + $0xb38] sm:$0xff]  ;;  %v1118_v5 = vld [vmem:[#allocation8 + $0xac0] sm:$0xff] }
  0xf9   :  { %2525 = vmatpush3.bf16.msra.mxu0 %v2524_v21  ;;  %v1184_v21 = vcombine.high %v1029_v7, %v1029_v7  ;;  %v1150_v7 = vld [vmem:[#allocation8 + $0xbc0] sm:$0xff] }
  0xfa   :  { %2527 = vmatprep.subr.bf16.mxu0 %v2526_v22  ;;  %v2576_v22 = vpack.c.bf16 %v1077_v17, %v1076_v14  ;;  %v1102_v14 = vld [vmem:[#allocation8 + $0xa40] sm:$0xff] }
  0xfb   :  { %2557 = vmatpush3.bf16.msra.mxu1 %v2556_v15  ;;  %v2544_v15 = vpack.c.bf16 %v1045_v12, %v1044_v10  ;;  %v2624_v10 = vpack.c.bf16 %v1133_v4, %v1132_v2  ;;  %v1134_v17 = vld [vmem:[#allocation8 + $0xb40] sm:$0xff]  ;;  %v1504_v2 = vld [vmem:[#allocation8 + $0xc08] sm:$0xff] }
  0xfc   :  { %2559 = vmatprep.subr.bf16.mxu1 %v2558_v26  ;;  %v1126_v26 = vld [vmem:[#allocation8 + $0xb00] sm:$0xff] }
  0xfd   :  { %2529 = vmatpush3.bf16.msra.mxu0 %v2528_v32  ;;  %v1144_v32 = vld [vmem:[#allocation8 + $0xb90] sm:$0xff]  ;;  %v2612_v37 = vpack.c.bf16 %v1127_v28, %v1126_v26  ;;  %v1105_v26 = vld [vmem:[#allocation8 + $0xa58] sm:$0xff] }
  0xfe   :  { %2531 = vmatprep.subr.bf16.mxu0 %v2530_v35  ;;  %v3044_v35 = vrot.slane %v1184_v21, %v2990_v13  ;;  %v1152_v21 = vld [vmem:[#allocation8 + $0xbd0] sm:$0xff] }
  0xff   :  { %2561 = vmatpush3.bf16.msra.mxu1 %v2560_v34  ;;  %v1145_v34 = vld [vmem:[#allocation8 + $0xb98] sm:$0xff] }
 0x100   :  { %2563 = vmatprep.subr.bf16.mxu1 %v2562_v42  ;;  %v1096_v42 = vld [vmem:[#allocation8 + $0xa10] sm:$0xff]  ;;  %v2614_v41 = vpack.c.bf16 %v1145_v34, %v1144_v32  ;;  %v1200_v49 = vcombine.high %v3044_v35, %v3044_v35  ;;  %v1123_v32 = vld [vmem:[#allocation8 + $0xae8] sm:$0xff]  ;;  %v1154_v34 = vld [vmem:[#allocation8 + $0xbe0] sm:$0xff] }
 0x101   :  { %2533 = vmatpush3.bf16.msra.mxu0 %v2532_v44  ;;  %v1115_v44 = vld [vmem:[#allocation8 + $0xaa8] sm:$0xff]  ;;  %v2584_v50 = vpack.c.bf16 %v1097_v39, %v1096_v42  ;;  %v2602_v42 = vpack.c.bf16 %v1123_v32, %v1122_v30  ;;  %v1106_v39 = vld [vmem:[#allocation8 + $0xa60] sm:$0xff] }
 0x102   :  { %2535 = vmatprep.subr.bf16.mxu0 %v2534_v47  ;;  %v1146_v47 = vld [vmem:[#allocation8 + $0xba0] sm:$0xff]  ;;  %v2586_v53 = vpack.c.bf16 %v1115_v44, %v1114_v52  ;;  %v1139_v52 = vld [vmem:[#allocation8 + $0xb68] sm:$0xff]  ;;  %v1124_v44 = vld [vmem:[#allocation8 + $0xaf0] sm:$0xff] }
 0x103   :  { %2565 = vmatpush3.bf16.msra.mxu1 %v2564_v46  ;;  %v1199_v46 = vcombine.high %v3041_v31, %v3041_v31  ;;  %v2618_v33 = vpack.c.bf16 %v1147_v48, %v1146_v47  ;;  %v1156_v47 = vld [vmem:[#allocation8 + $0xbf0] sm:$0xff]  ;;  %v1157_v48 = vld [vmem:[#allocation8 + $0xbf8] sm:$0xff]  ;;  %v1508_v30 = vld [vmem:[#allocation8 + $0xc28] sm:$0xff] }
 0x104   :  { %2567 = vmatprep.subr.bf16.mxu1 %v2566_v51  ;;  %v2616_v51 = vpack.c.bf16 %v1129_v43, %v1128_v40  ;;  %v1107_v40 = vld [vmem:[#allocation8 + $0xa68] sm:$0xff]  ;;  %v1539_v32 = vld [vmem:[#allocation8 + $0xd20] sm:$0xff] }
 0x105   :  { %2537 = vmatpush3.bf16.msra.mxu0 %v2536_v59  ;;  %v1131_v59 = vld [vmem:[#allocation8 + $0xb28] sm:$0xff] }
 0x106   :  { %2539 = vmatprep.subr.bf16.mxu0 %v2538_v61  ;;  %v1148_v61 = vld [vmem:[#allocation8 + $0xbb0] sm:$0xff] }
 0x107   :  { %2569 = vmatpush3.bf16.msra.mxu1 %v2568_v60  ;;  %v1117_v60 = vld [vmem:[#allocation8 + $0xab8] sm:$0xff]  ;;  %v2622_v3 = vpack.c.bf16 %v1149_v62, %v1148_v61  ;;  %v1551_v61 = vld [vmem:[#allocation8 + $0xd80] sm:$0xff]  ;;  %v1552_v62 = vld [vmem:[#allocation8 + $0xd88] sm:$0xff] }
 0x108   :  { %2571 = vmatprep.subr.bf16.mxu1 %v2570_v45  ;;  %v1100_v45 = vld [vmem:[#allocation8 + $0xa30] sm:$0xff]  ;;  %v2674_v4 = vpack.c.bf16 %v1552_v62, %v1551_v61  ;;  %v1530_v61 = vld [vmem:[#allocation8 + $0xcd8] sm:$0xff] }
 0x109   :  { %2541 = vmatpush3.bf16.msra.mxu0 %v2540_v6  ;;  %v1119_v6 = vld [vmem:[#allocation8 + $0xac8] sm:$0xff]  ;;  %v1561_v62 = vld [vmem:[#allocation8 + $0xdd0] sm:$0xff] }
 0x10a   :  { %2543 = vmatprep.subr.bf16.mxu0 %v2542_v9  ;;  %v2592_v9 = vpack.c.bf16 %v1101_v1, %v1100_v45  ;;  %v2594_v12 = vpack.c.bf16 %v1119_v6, %v1118_v5  ;;  %v1503_v1 = vld [vmem:[#allocation8 + $0xc00] sm:$0xff]  ;;  %v1536_v5 = vld [vmem:[#allocation8 + $0xd08] sm:$0xff]  ;;  %v1521_v6 = vld [vmem:[#allocation8 + $0xc90] sm:$0xff] }
 0x10b   :  { %2573 = vmatpush3.bf16.msra.mxu1 %v2572_v8  ;;  %v1151_v8 = vld [vmem:[#allocation8 + $0xbc8] sm:$0xff] }
 0x10c   :  { %2575 = vmatprep.subr.bf16.mxu1 %v2574_v16  ;;  %v1103_v16 = vld [vmem:[#allocation8 + $0xa48] sm:$0xff]  ;;  %v2626_v11 = vpack.c.bf16 %v1151_v8, %v1150_v7  ;;  %v1522_v7 = vld [vmem:[#allocation8 + $0xc98] sm:$0xff] }
 0x10d   :  { %2545 = vmatpush3.bf16.msra.mxu0 %v2544_v15  ;;  %v1153_v15 = vld [vmem:[#allocation8 + $0xbd8] sm:$0xff] }
 0x10e   :  { %2579 = vmatprep.subr.bf16.mxu0 %v2578_v23  ;;  %v2628_v23 = vpack.c.bf16 %v1135_v18, %v1134_v17  ;;  %v2630_v28 = vpack.c.bf16 %v1153_v15, %v1152_v21  ;;  %v2646_v17 = vpack.c.bf16 %v1522_v7, %v1521_v6  ;;  %v1506_v18 = vld [vmem:[#allocation8 + $0xc18] sm:$0xff]  ;;  %v1523_v15 = vld [vmem:[#allocation8 + $0xca0] sm:$0xff]  ;;  %v1532_v7 = vld [vmem:[#allocation8 + $0xce8] sm:$0xff] }
 0x10f   :  { %2577 = vmatpush3.bf16.msra.mxu1 %v2576_v22  ;;  %v2596_v22 = vpack.c.bf16 %v1103_v16, %v1102_v14  ;;  %v2644_v14 = vpack.c.bf16 %v1504_v2, %v1503_v1  ;;  %v1538_v21 = vld [vmem:[#allocation8 + $0xd18] sm:$0xff]  ;;  %v1513_v1 = vld [vmem:[#allocation8 + $0xc50] sm:$0xff]  ;;  %v1531_v6 = vld [vmem:[#allocation8 + $0xce0] sm:$0xff] }
 0x110   :  { %2611 = vmatprep.subr.bf16.mxu1 %v2610_v27  ;;  %1274 = vmatmul.mubr.f32.vlgmr.msra.gmra.mrb[8].mxu0 %v3029_v55  ;;  %v1116_v55 = vld [vmem:[#allocation8 + $0xab0] sm:$0xff]  ;;  %v1514_v2 = vld [vmem:[#allocation8 + $0xc58] sm:$0xff] }
 0x111   :  { %2581 = vmatpush3.bf16.msra.mxu0 %v2580_v36  ;;  %1413 = vmatprep.mubr.f32.mxu0 %v1199_v46  ;;  %v2590_v0 = vpack.c.bf16 %v1117_v60, %v1116_v55  ;;  %v1136_v27 = vld [vmem:[#allocation8 + $0xb50] sm:$0xff]  ;;  %v1155_v36 = vld [vmem:[#allocation8 + $0xbe8] sm:$0xff]  ;;  %v1125_v46 = vld [vmem:[#allocation8 + $0xaf8] sm:$0xff] }
 0x112   :  { %1344 = vmatmul.mubr.f32.vlgmr.msra.gmra.mrb[8].mxu1 %v3032_v58  ;;  %2583 = vmatprep.subr.bf16.mxu0 %v2582_v38  ;;  %v2620_v58 = vpack.c.bf16 %v1131_v59, %v1130_v57  ;;  %v2632_v38 = vpack.c.bf16 %v1137_v29, %v1136_v27  ;;  %v2634_v43 = vpack.c.bf16 %v1155_v36, %v1154_v34  ;;  %v1140_v57 = vld [vmem:[#allocation8 + $0xb70] sm:$0xff]  ;;  %v1141_v59 = vld [vmem:[#allocation8 + $0xb78] sm:$0xff]  ;;  %v1519_v55 = vld [vmem:[#allocation8 + $0xc80] sm:$0xff] }
 0x113   :  { %2613 = vmatpush3.bf16.msra.mxu1 %v2612_v37  ;;  %1483 = vmatprep.mubr.f32.mxu1 %v1200_v49  ;;  %v2600_v37 = vpack.c.bf16 %v1105_v26, %v1104_v25  ;;  %v2604_v49 = vpack.c.bf16 %v1107_v40, %v1106_v39  ;;  %v1520_v60 = vld [vmem:[#allocation8 + $0xc88] sm:$0xff]  ;;  %v2680_v27 = vpack.c.bf16 %v1538_v21, %v1537_v19  ;;  %v1507_v29 = vld [vmem:[#allocation8 + $0xc20] sm:$0xff] }
 0x114   :  { %2615 = vmatprep.subr.bf16.mxu1 %v2614_v41  ;;  %v1138_v41 = vld [vmem:[#allocation8 + $0xb60] sm:$0xff]  ;;  %v2642_v45 = vpack.c.bf16 %v1520_v60, %v1519_v55  ;;  %v1540_v36 = vld [vmem:[#allocation8 + $0xd28] sm:$0xff]  ;;  %v2652_v39 = vpack.c.bf16 %v1508_v30, %v1507_v29  ;;  %v1529_v60 = vld [vmem:[#allocation8 + $0xcd0] sm:$0xff] }
 0x115   :  { %2585 = vmatpush3.bf16.msra.mxu0 %v2584_v50  ;;  %v1502_v50 = vld [vmem:[#allocation7] sm:$0xff]  ;;  %v1544_v55 = vld [vmem:[#allocation8 + $0xd48] sm:$0xff]  ;;  %v1547_v19 = vld [vmem:[#allocation8 + $0xd60] sm:$0xff] }
 0x116   :  { %2587 = vmatprep.subr.bf16.mxu0 %v2586_v53  ;;  %v2606_v53 = vpack.c.bf16 %v1125_v46, %v1124_v44  ;;  %v3053_v8 = vrot.slane %v1502_v50, %v2990_v13  ;;  %v1542_v46 = vld [vmem:[#allocation8 + $0xd38] sm:$0xff]  ;;  %v1548_v21 = vld [vmem:[#allocation8 + $0xd68] sm:$0xff]  ;;  %v1549_v30 = vld [vmem:[#allocation8 + $0xd70] sm:$0xff] }
 0x117   :  { %2617 = vmatpush3.bf16.msra.mxu1 %v2616_v51  ;;  %v2636_v51 = vpack.c.bf16 %v1139_v52, %v1138_v41  ;;  %v1509_v41 = vld [vmem:[#allocation8 + $0xc30] sm:$0xff] }
 0x118   :  { %2619 = vmatprep.subr.bf16.mxu1 %v2618_v33  ;;  %v2638_v33 = vpack.c.bf16 %v1157_v48, %v1156_v47  ;;  %v1541_v52 = vld [vmem:[#allocation8 + $0xd30] sm:$0xff]  ;;  %v1527_v47 = vld [vmem:[#allocation8 + $0xcc0] sm:$0xff]  ;;  %v1528_v48 = vld [vmem:[#allocation8 + $0xcc8] sm:$0xff] }
 0x119   :  { %2589 = vmatpush3.bf16.msra.mxu0 %v2588_v63  ;;  %v1575_v63 = vcombine.high %v1502_v50, %v1502_v50  ;;  %v1560_v50 = vld [vmem:[#allocation8 + $0xdc8] sm:$0xff] }
 0x11a   :  { %2591 = vmatprep.subr.bf16.mxu0 %v2590_v0  ;;  %v2640_v0 = vpack.c.bf16 %v1141_v59, %v1140_v57  ;;  %v1512_v57 = vld [vmem:[#allocation8 + $0xc48] sm:$0xff] }
 0x11b   :  { %2621 = vmatpush3.bf16.msra.mxu1 %v2620_v58  ;;  %v2608_v58 = vpack.c.bf16 %v1109_v56, %v1108_v54  ;;  %v2658_v54 = vpack.c.bf16 %v1528_v48, %v1527_v47  ;;  %v1511_v56 = vld [vmem:[#allocation8 + $0xc40] sm:$0xff] }
 0x11c   :  { %2623 = vmatprep.subr.bf16.mxu1 %v2622_v3  ;;  %v1535_v3 = vld [vmem:[#allocation8 + $0xd00] sm:$0xff] }
 0x11d   :  { %2593 = vmatpush3.bf16.msra.mxu0 %v2592_v9  ;;  %v1553_v9 = vld [vmem:[#allocation8 + $0xd90] sm:$0xff]  ;;  %v2676_v16 = vpack.c.bf16 %v1536_v5, %v1535_v3  ;;  %v1546_v5 = vld [vmem:[#allocation8 + $0xd58] sm:$0xff] }
 0x11e   :  { %2595 = vmatprep.subr.bf16.mxu0 %v2594_v12  ;;  %v3056_v12 = vrot.slane %v1575_v63, %v2990_v13  ;;  %v1555_v13 = vld [vmem:[#allocation8 + $0xda0] sm:$0xff]  ;;  %v1562_v63 = vld [vmem:[#allocation8 + $0xdd8] sm:$0xff]  ;;  %v1545_v3 = vld [vmem:[#allocation8 + $0xd50] sm:$0xff] }
 0x11f   :  { %2625 = vmatpush3.bf16.msra.mxu1 %v2624_v10  ;;  %v1554_v10 = vld [vmem:[#allocation8 + $0xd98] sm:$0xff] }
 0x120   :  { %2627 = vmatprep.subr.bf16.mxu1 %v2626_v11  ;;  %v1505_v11 = vld [vmem:[#allocation8 + $0xc10] sm:$0xff]  ;;  %v2678_v20 = vpack.c.bf16 %v1554_v10, %v1553_v9  ;;  %v1591_v25 = vcombine.high %v3056_v12, %v3056_v12  ;;  %v1563_v9 = vld [vmem:[#allocation8 + $0xde0] sm:$0xff]  ;;  %v1564_v10 = vld [vmem:[#allocation8 + $0xde8] sm:$0xff] }
 0x121   :  { %2597 = vmatpush3.bf16.msra.mxu0 %v2596_v22  ;;  %v1524_v22 = vld [vmem:[#allocation8 + $0xca8] sm:$0xff]  ;;  %v2648_v26 = vpack.c.bf16 %v1506_v18, %v1505_v11  ;;  %v1515_v11 = vld [vmem:[#allocation8 + $0xc60] sm:$0xff] }
 0x122   :  { %2599 = vmatprep.subr.bf16.mxu0 %v2598_v24  ;;  %v1556_v24 = vld [vmem:[#allocation8 + $0xda8] sm:$0xff] }
 0x123   :  { %2629 = vmatpush3.bf16.msra.mxu1 %v2628_v23  ;;  %v1590_v23 = vcombine.high %v3053_v8, %v3053_v8  ;;  %v2682_v34 = vpack.c.bf16 %v1556_v24, %v1555_v13  ;;  %v1516_v18 = vld [vmem:[#allocation8 + $0xc68] sm:$0xff]  ;;  %v1566_v13 = vld [vmem:[#allocation8 + $0xdf8] sm:$0xff] }
 0x124   :  { %2631 = vmatprep.subr.bf16.mxu1 %v2630_v28  ;;  %v2650_v28 = vpack.c.bf16 %v1524_v22, %v1523_v15  ;;  %v1533_v15 = vld [vmem:[#allocation8 + $0xcf0] sm:$0xff]  ;;  %v1534_v22 = vld [vmem:[#allocation8 + $0xcf8] sm:$0xff]  ;;  %v2668_v24 = vpack.c.bf16 %v1516_v18, %v1515_v11 }
 0x125   :  { %2601 = vmatpush3.bf16.msra.mxu0 %v2600_v37  ;;  %v1526_v37 = vld [vmem:[#allocation8 + $0xcb8] sm:$0xff] }
 0x126   :  { %2603 = vmatprep.subr.bf16.mxu0 %v2602_v42  ;;  %v1558_v42 = vld [vmem:[#allocation8 + $0xdb8] sm:$0xff] }
 0x127   :  { %2633 = vmatpush3.bf16.msra.mxu1 %v2632_v38  ;;  %v1557_v38 = vld [vmem:[#allocation8 + $0xdb0] sm:$0xff] }
 0x128   :  { %2635 = vmatprep.subr.bf16.mxu1 %v2634_v43  ;;  %v1510_v43 = vld [vmem:[#allocation8 + $0xc38] sm:$0xff]  ;;  %v2686_v44 = vpack.c.bf16 %v1558_v42, %v1557_v38 }
 0x129   :  { %2605 = vmatpush3.bf16.msra.mxu0 %v2604_v49  ;;  %v1559_v49 = vld [vmem:[#allocation8 + $0xdc0] sm:$0xff] }
 0x12a   :  { %2607 = vmatprep.subr.bf16.mxu0 %v2606_v53  ;;  %v2688_v53 = vpack.c.bf16 %v1542_v46, %v1541_v52  ;;  %v2690_v59 = vpack.c.bf16 %v1560_v50, %v1559_v49 }
 0x12b   :  { %2637 = vmatpush3.bf16.msra.mxu1 %v2636_v51  ;;  %v2656_v51 = vpack.c.bf16 %v1510_v43, %v1509_v41 }
 0x12c   :  { %2639 = vmatprep.subr.bf16.mxu1 %v2638_v33  ;;  %v1543_v33 = vld [vmem:[#allocation8 + $0xd40] sm:$0xff] }
 0x12d   :  { %2609 = vmatpush3.bf16.msra.mxu0 %v2608_v58  ;;  %v2660_v58 = vpack.c.bf16 %v1512_v57, %v1511_v56 }
 0x12e   :  { %2643 = vmatprep.subr.bf16.mxu0 %v2642_v45  ;;  %v2662_v45 = vpack.c.bf16 %v1530_v61, %v1529_v60 }
 0x12f   :  { %2641 = vmatpush3.bf16.msra.mxu1 %v2640_v0  ;;  %v2692_v0 = vpack.c.bf16 %v1544_v55, %v1543_v33 }
 0x130   :  { %2675 = vmatprep.subr.bf16.mxu1 %v2674_v4  ;;  %1414 = vmatmul.mubr.f32.vlgmr.msra.gmra.mrb[10].mxu0 %v3041_v31  ;;  %v1525_v31 = vld [vmem:[#allocation8 + $0xcb0] sm:$0xff]  ;;  %v2694_v4 = vpack.c.bf16 %v1562_v63, %v1561_v62 }
 0x131   :  { %2645 = vmatpush3.bf16.msra.mxu0 %v2644_v14  ;;  %1660 = vmatprep.mubr.f32.mxu0 %v1590_v23  ;;  %v2654_v40 = vpack.c.bf16 %v1526_v37, %v1525_v31  ;;  %v2664_v14 = vpack.c.bf16 %v1514_v2, %v1513_v1  ;;  %v1565_v23 = vld [vmem:[#allocation8 + $0xdf0] sm:$0xff]  ;;  %v1762_v37 = vld [vmem:[#allocation10] ss:$0 sm:$0xff]  ;;  %v1763_v1 = vld [vmem:[#allocation11] ss:$0 sm:$0xff] }
 0x132   :  { %1484 = vmatmul.mubr.f32.vlgmr.msra.gmra.mrb[10].mxu1 %v3044_v35  ;;  %2647 = vmatprep.subr.bf16.mxu0 %v2646_v17  ;;  %v2684_v35 = vpack.c.bf16 %v1540_v36, %v1539_v32  ;;  %v2666_v17 = vpack.c.bf16 %v1532_v7, %v1531_v6  ;;  %v2702_v29 = vpack.c.bf16 %v1566_v13, %v1565_v23  ;;  %v1550_v32 = vld [vmem:[#allocation8 + $0xd78] sm:$0xff]  ;;  %v1764_v6 = vld [vmem:[#allocation10 + $0x1] ss:$0 sm:$0xff] }
 0x133   :  { %2677 = vmatpush3.bf16.msra.mxu1 %v2676_v16  ;;  %1730 = vmatprep.mubr.f32.mxu1 %v1591_v25  ;;  %v2696_v16 = vpack.c.bf16 %v1546_v5, %v1545_v3  ;;  %v2700_v25 = vpack.c.bf16 %v1548_v21, %v1547_v19  ;;  %v2704_v36 = vpack.c.bf16 %v1550_v32, %v1549_v30 }
 0x134   :  { %2679 = vmatprep.subr.bf16.mxu1 %v2678_v20  ;;  %v2698_v20 = vpack.c.bf16 %v1564_v10, %v1563_v9 }
 0x135   :  { %2649 = vmatpush3.bf16.msra.mxu0 %v2648_v26  ;;  %v2670_v26 = vpack.c.bf16 %v1534_v22, %v1533_v15 }
 0x136   :  { %2651 = vmatprep.subr.bf16.mxu0 %v2650_v28  ;;  %v1518_v28 = vld [vmem:[#allocation8 + $0xc78] sm:$0xff] }
 0x137   :  { %2681 = vmatpush3.bf16.msra.mxu1 %v2680_v27  ;;  %v1517_v27 = vld [vmem:[#allocation8 + $0xc70] sm:$0xff] }
 0x138   :  { %2683 = vmatprep.subr.bf16.mxu1 %v2682_v34  ;;  %v2672_v34 = vpack.c.bf16 %v1518_v28, %v1517_v27 }
 0x139   :  { %2653 = vmatpush3.bf16.msra.mxu0 %v2652_v39 }
 0x13a   :  { %2655 = vmatprep.subr.bf16.mxu0 %v2654_v40 }
 0x13b   :  { %2685 = vmatpush3.bf16.msra.mxu1 %v2684_v35 }
 0x13c   :  { %2687 = vmatprep.subr.bf16.mxu1 %v2686_v44 }
 0x13d   :  { %2657 = vmatpush3.bf16.msra.mxu0 %v2656_v51 }
 0x13e   :  { %2659 = vmatprep.subr.bf16.mxu0 %v2658_v54 }
 0x13f   :  { %2689 = vmatpush3.bf16.msra.mxu1 %v2688_v53 }
 0x140   :  { %2691 = vmatprep.subr.bf16.mxu1 %v2690_v59 }
 0x141   :  { %2661 = vmatpush3.bf16.msra.mxu0 %v2660_v58 }
 0x142   :  { %2663 = vmatprep.subr.bf16.mxu0 %v2662_v45 }
 0x143   :  { %2693 = vmatpush3.bf16.msra.mxu1 %v2692_v0 }
 0x144   :  { %2695 = vmatprep.subr.bf16.mxu1 %v2694_v4 }
 0x145   :  { %2665 = vmatpush3.bf16.msra.mxu0 %v2664_v14 }
 0x146   :  { %2667 = vmatprep.subr.bf16.mxu0 %v2666_v17 }
 0x147   :  { %2697 = vmatpush3.bf16.msra.mxu1 %v2696_v16 }
 0x148   :  { %2699 = vmatprep.subr.bf16.mxu1 %v2698_v20 }
 0x149   :  { %2669 = vmatpush3.bf16.msra.mxu0 %v2668_v24  ;;  %v1765_v24 = vld [vmem:[#allocation11 + $0x1] ss:$0 sm:$0xff] }
 0x14a   :  { %2671 = vmatprep.subr.bf16.mxu0 %v2670_v26 }
 0x14b   :  { %2701 = vmatpush3.bf16.msra.mxu1 %v2700_v25 }
 0x14c   :  { %2703 = vmatprep.subr.bf16.mxu1 %v2702_v29  ;;  %v1766_v29 = vld [vmem:[#allocation10 + $0x2] ss:$0 sm:$0xff] }
 0x14d   :  { %2673 = vmatpush3.bf16.msra.mxu0 %v2672_v34 }
 0x14f   :  { %2705 = vmatpush3.bf16.msra.mxu1 %v2704_v36 }
 0x150   :  { %1661 = vmatmul.mubr.f32.vlgmr.msra.gmra.mrb[12].mxu0 %v3053_v8 }
 0x152   :  { %1731 = vmatmul.mubr.f32.vlgmr.msra.gmra.mrb[12].mxu1 %v3056_v12 }
 0x163   :  { %v1800_v31 = vpop.f32.mrb[0].mxu0 }
 0x164   :  { %v1801_v38 = vpop.f32.mrb[1].mxu0 }
 0x165   :  { %v1835_v42 = vpop.f32.mrb[0].mxu1  ;;  %v1802_v39 = vadd.f32 %v1801_v38, %v1800_v31 }
 0x166   :  { %v1836_v35 = vpop.f32.mrb[1].mxu1 }
 0x167   :  { %v1837_v40 = vadd.f32 %v1836_v35, %v1835_v42  ;;  %v521_v41 = vadd.f32 %v1802_v39, %v1762_v37  ;;  %v1767_v42 = vld [vmem:[#allocation11 + $0x2] ss:$0 sm:$0xff] }
 0x169   :  { %v591_v43 = vadd.f32 %v1837_v40, %v521_v41 }
 0x183   :  { %v1870_v52 = vpop.f32.mrb[2].mxu0 }
 0x184   :  { %v1871_v44 = vpop.f32.mrb[3].mxu0 }
 0x185   :  { %v1905_v46 = vpop.f32.mrb[2].mxu1  ;;  %v1872_v47 = vadd.f32 %v1871_v44, %v1870_v52  ;;  %v1750_v44 = vstv %s3081_s6 }
 0x186   :  { %v1906_v48 = vpop.f32.mrb[3].mxu1 }
 0x187   :  { %v1907_v49 = vadd.f32 %v1906_v48, %v1905_v46  ;;  %v661_v50 = vadd.f32 %v1872_v47, %v591_v43 }
 0x189   :  { %v731_v51 = vadd.f32 %v1907_v49, %v661_v50 }
 0x1a3   :  { %v1940_v8 = vpop.f32.mrb[4].mxu0 }
 0x1a4   :  { %v1941_v53 = vpop.f32.mrb[5].mxu0 }
 0x1a5   :  { %v1975_v12 = vpop.f32.mrb[4].mxu1  ;;  %v1942_v54 = vadd.f32 %v1941_v53, %v1940_v8 }
 0x1a6   :  { %v1976_v56 = vpop.f32.mrb[5].mxu1 }
 0x1a7   :  { %v1977_v57 = vadd.f32 %v1976_v56, %v1975_v12  ;;  %v801_v33 = vadd.f32 %v1942_v54, %v731_v51 }
 0x1a9   :  { %v871_v59 = vadd.f32 %v1977_v57, %v801_v33 }
 0x1c3   :  { %v2010_v55 = vpop.f32.mrb[6].mxu0 }
 0x1c4   :  { %v2011_v60 = vpop.f32.mrb[7].mxu0 }
 0x1c5   :  { %v2045_v61 = vpop.f32.mrb[6].mxu1  ;;  %v2012_v62 = vadd.f32 %v2011_v60, %v2010_v55 }
 0x1c6   :  { %v2046_v63 = vpop.f32.mrb[7].mxu1 }
 0x1c7   :  { %v2047_v58 = vadd.f32 %v2046_v63, %v2045_v61  ;;  %v941_v0 = vadd.f32 %v2012_v62, %v871_v59 }
 0x1c9   :  { %v1011_v45 = vadd.f32 %v2047_v58, %v941_v0 }
 0x1cb   :  { %v1014_v2 = vmax.f32 %v1011_v45, 0.0 }
 0x1cd   :  { %v1022_v3 = vmul.f32 %v1763_v1, %v1014_v2 }
 0x1cf   :  { %v1024_v4 = vsel %vm1023_vm0, %v1022_v3, 0.0 }
 0x1d0   :  { %1025 = vadd.xlane.f32.xlu0 %v1024_v4 }
 0x1e3   :  { %v2080_v5 = vpop.f32.mrb[8].mxu0 }
 0x1e4   :  { %v2081_v7 = vpop.f32.mrb[9].mxu0 }
 0x1e5   :  { %v2115_v9 = vpop.f32.mrb[8].mxu1  ;;  %v2082_v10 = vadd.f32 %v2081_v7, %v2080_v5 }
 0x1e6   :  { %v2116_v14 = vpop.f32.mrb[9].mxu1 }
 0x1e7   :  { %v2117_v16 = vadd.f32 %v2116_v14, %v2115_v9  ;;  %v1276_v17 = vadd.f32 %v2082_v10, %v1764_v6 }
 0x1e9   :  { %v1346_v11 = vadd.f32 %v2117_v16, %v1276_v17 }
 0x203   :  { %v2150_v18 = vpop.f32.mrb[10].mxu0 }
 0x204   :  { %v2151_v19 = vpop.f32.mrb[11].mxu0 }
 0x205   :  { %v2185_v20 = vpop.f32.mrb[10].mxu1  ;;  %v2152_v21 = vadd.f32 %v2151_v19, %v2150_v18 }
 0x206   :  { %v2186_v15 = vpop.f32.mrb[11].mxu1 }
 0x207   :  { %v2187_v22 = vadd.f32 %v2186_v15, %v2185_v20  ;;  %v1416_v23 = vadd.f32 %v2152_v21, %v1346_v11 }
 0x209   :  { %v1486_v13 = vadd.f32 %v2187_v22, %v1416_v23 }
 0x20b   :  { %v1489_v25 = vmax.f32 %v1486_v13, 0.0 }
 0x20d   :  { %v1497_v26 = vmul.f32 %v1765_v24, %v1489_v25 }
 0x20f   :  { %v1498_v27 = vsel %vm1023_vm0, %v1497_v26, 0.0 }
 0x210   :  { %1499 = vadd.xlane.f32.xlu0 %v1498_v27 }
 0x223   :  { %v2220_v28 = vpop.f32.mrb[12].mxu0 }
 0x224   :  { %v2221_v30 = vpop.f32.mrb[13].mxu0 }
 0x225   :  { %v2255_v32 = vpop.f32.mrb[12].mxu1  ;;  %v2222_v34 = vadd.f32 %v2221_v30, %v2220_v28 }
 0x226   :  { %v2256_v36 = vpop.f32.mrb[13].mxu1 }
 0x227   :  { %v2257_v31 = vadd.f32 %v2256_v36, %v2255_v32  ;;  %v1663_v37 = vadd.f32 %v2222_v34, %v1766_v29 }
 0x229   :  { %v1733_v38 = vadd.f32 %v2257_v31, %v1663_v37 }
 0x22b   :  { %v1736_v39 = vmax.f32 %v1733_v38, 0.0 }
 0x22d   :  { %v1744_v35 = vmul.f32 %v1767_v42, %v1736_v39 }
 0x22f   :  { %v1745_v40 = vsel %vm1023_vm0, %v1744_v35, 0.0 }
 0x230   :  { %1746 = vadd.xlane.f32.xlu1 %v1745_v40 }
 0x25d   :  { %v1026_v41 = vpop.xlane.xlu0 %1025 }
 0x29d   :  { %v1500_v43 = vpop.xlane.xlu0 %1499 }
 0x29e   :  { %v1501_v52 = vadd.f32 %v1500_v43, %v1026_v41 }
 0x2bd   :  { %v1747_v46 = vpop.xlane.xlu1 %1746 }
 0x2be   :  { %v1748_v47 = vadd.f32 %v1747_v46, %v1501_v52 }
 0x2c0   :  { %v1751_v48 = vadd.f32 %v1750_v44, %v1748_v47 }
 0x2c2   :  { %1753 = vst.msk [vmem:[%s3082_s7] sm:$0x3] %vm1752_vm1, %v1751_v48 }
 0x2c3   :  { %1758 = vsyncpa [#allocation4], 1 }
 0x2c4   :  { %1759 = vsyncpa [#allocation6], 1 }
 0x2c5   :  { %1760 = vsyncpa [#allocation9], 1 }
 0x2c6   :  { %1761 = vsyncpa [#allocation12], 1 }

</bundles_post_ra>
